<compile_context>
chip_gen: v7x
topology: tpu7x:2x2x1
jax: 0.10.0
libtpu: 0.0.40
codegen_flags: <defaults>
</compile_context>

<pallas_src>
import jax
import jax.numpy as jnp
from jax.experimental import pallas as pl
from jax.experimental.pallas import tpu as pltpu


IN_FEATURES = 28 * 28          # 784 (multiple of 16 -> fine as un-padded MXU K dim)
OUT_FEATURES = 10
OUT_PAD = 128                  # lane-dense logits width (unmasked vst)
HID_PAD = 128                  # fc4 output padded to full lane width
_MIN_TILE = 16                 # bf16 packs 2 rows per sublane -> 16-aligned batch tiles


def _cdiv(a, b):
    return (a + b - 1) // b


def _round_up(v, m):
    return _cdiv(v, m) * m


def _mlp_kernel(x_ref,
                w1_ref, b1_ref,
                w2_ref, b2_ref,
                w3_ref, b3_ref,
                w4_ref, b4_ref,
                w5_ref, b5_ref,
                o_ref):
    # x arrives f32 straight from HBM; cast to bf16 here (no separate XLA pad/cast pass).
    x = x_ref[...].astype(jnp.bfloat16)

    h = jnp.dot(x, w1_ref[...], preferred_element_type=jnp.float32) + b1_ref[...]
    h = jnp.maximum(h, 0.0).astype(jnp.bfloat16)
    # TODO(synk): training-mode dropout (p=0.3) not applied here (eval semantics).

    h = jnp.dot(h, w2_ref[...], preferred_element_type=jnp.float32) + b2_ref[...]
    h = jnp.maximum(h, 0.0).astype(jnp.bfloat16)

    h = jnp.dot(h, w3_ref[...], preferred_element_type=jnp.float32) + b3_ref[...]
    h = jnp.maximum(h, 0.0).astype(jnp.bfloat16)

    # fc4 output zero-padded to 128 lanes (padded cols/bias are zero; relu keeps them zero).
    h = jnp.dot(h, w4_ref[...], preferred_element_type=jnp.float32) + b4_ref[...]
    h = jnp.maximum(h, 0.0).astype(jnp.bfloat16)

    # fc5 weights zero-padded to (128, 128) -> lane-dense, unmasked (bt, 128) stores.
    out = jnp.dot(h, w5_ref[...], preferred_element_type=jnp.float32) + b5_ref[...]
    o_ref[...] = out.astype(o_ref.dtype)


def prepare_params(params):
    """One-time param prep: pad to lane-dense shapes and cast weights to bf16.

    Call once (outside the per-step forward) so weights are not re-padded / re-cast
    and re-read from HBM on every forward call.
    """
    w4 = jnp.pad(params["w4"], ((0, 0), (0, HID_PAD - params["w4"].shape[1])))
    w5 = jnp.pad(params["w5"],
                 ((0, HID_PAD - params["w5"].shape[0]),
                  (0, OUT_PAD - params["w5"].shape[1])))
    b4 = jnp.pad(params["b4"], ((0, 0), (0, HID_PAD - params["b4"].shape[1])))
    b5 = jnp.pad(params["b5"], ((0, 0), (0, OUT_PAD - params["b5"].shape[1])))
    return dict(
        w1=params["w1"].astype(jnp.bfloat16),
        w2=params["w2"].astype(jnp.bfloat16),
        w3=params["w3"].astype(jnp.bfloat16),
        w4=w4.astype(jnp.bfloat16),
        w5=w5.astype(jnp.bfloat16),
        b1=params["b1"], b2=params["b2"], b3=params["b3"],   # biases stay f32 (tiny)
        b4=b4, b5=b5,
    )


def deep_nn_forward(x, prepared, *, batch_tile=1024):
    """x: (B, 1, 28, 28) or (B, 784) float32. prepared: output of prepare_params().

    Returns (B, 10) float32 logits (eval-mode semantics; dropout is identity).
    """
    x = x.reshape(-1, IN_FEATURES)                 # mirrors x.view(-1, 28*28)
    B = x.shape[0]

    # Tile count first, tile size second: pad waste bounded by ~15 rows per tile
    # (no rounding B up to the next batch_tile multiple). Force >=2 grid steps when the
    # batch allows so a v7x second TensorCore has work on the PARALLEL axis.
    num_tiles = _cdiv(B, batch_tile)
    if num_tiles == 1 and B >= 2 * _MIN_TILE:
        num_tiles = 2
    bt = _round_up(_cdiv(B, num_tiles), _MIN_TILE)
    B_pad = num_tiles * bt

    xp = x if B_pad == B else jnp.pad(x, ((0, B_pad - B), (0, 0)))

    def const_spec(shape):
        # whole-array block, constant index across the grid -> fetched once, revisited.
        return pl.BlockSpec(shape, lambda i: (0, 0))

    param_bytes = sum(int(prepared[k].size) * prepared[k].dtype.itemsize
                      for k in ("w1", "w2", "w3", "w4", "w5",
                                "b1", "b2", "b3", "b4", "b5"))
    flops_per_row = 2 * (IN_FEATURES * 512 + 512 * 256 + 256 * 128
                         + 128 * HID_PAD + HID_PAD * OUT_PAD)
    cost = pl.CostEstimate(
        flops=flops_per_row * B_pad,
        transcendentals=0,
        bytes_accessed=B_pad * IN_FEATURES * 4 + param_bytes + B_pad * OUT_PAD * 2,
    )

    out = pl.pallas_call(
        _mlp_kernel,
        out_shape=jax.ShapeDtypeStruct((B_pad, OUT_PAD), jnp.bfloat16),
        grid_spec=pltpu.PrefetchScalarGridSpec(
            num_scalar_prefetch=0,
            grid=(num_tiles,),
            in_specs=[
                pl.BlockSpec((bt, IN_FEATURES), lambda i: (i, 0)),   # x tiled over batch
                const_spec(prepared["w1"].shape), const_spec(prepared["b1"].shape),
                const_spec(prepared["w2"].shape), const_spec(prepared["b2"].shape),
                const_spec(prepared["w3"].shape), const_spec(prepared["b3"].shape),
                const_spec(prepared["w4"].shape), const_spec(prepared["b4"].shape),
                const_spec(prepared["w5"].shape), const_spec(prepared["b5"].shape),
            ],
            out_specs=pl.BlockSpec((bt, OUT_PAD), lambda i: (i, 0)),
        ),
        compiler_params=pltpu.CompilerParams(
            dimension_semantics=(pltpu.PARALLEL,),
            # ~15 MiB actually needed at bt=1024; 48 MiB stays below v7x's 64 MiB physical
            # and avoids the tight 16 MiB default scoped limit on v5e.
            vmem_limit_bytes=48 * 1024 * 1024,
        ),
        cost_estimate=cost,
    )(xp, prepared["w1"], prepared["b1"], prepared["w2"], prepared["b2"],
      prepared["w3"], prepared["b3"], prepared["w4"], prepared["b4"],
      prepared["w5"], prepared["b5"])

    return out[:B, :OUT_FEATURES].astype(jnp.float32)


def init_params(key):
    """Deterministic init mimicking PyTorch nn.Linear default: U(-1/sqrt(fan_in), +1/sqrt(fan_in))."""
    dims = [(IN_FEATURES, 512), (512, 256), (256, 128), (128, 64), (64, OUT_FEATURES)]
    params = {}
    for idx, (fan_in, fan_out) in enumerate(dims, start=1):
        key, kw, kb = jax.random.split(key, 3)
        bound = 1.0 / jnp.sqrt(jnp.float32(fan_in))
        # stored as (in, out) -> kernel computes x @ W
        params[f"w{idx}"] = jax.random.uniform(
            kw, (fan_in, fan_out), jnp.float32, minval=-bound, maxval=bound)
        params[f"b{idx}"] = jax.random.uniform(
            kb, (1, fan_out), jnp.float32, minval=-bound, maxval=bound)
    return params


def reference_forward(x, params):
    h = x
    for idx in range(1, 5):
        h = jnp.maximum(h @ params[f"w{idx}"] + params[f"b{idx}"], 0.0)
    return h @ params["w5"] + params["b5"]


if __name__ == "__main__":
    key = jax.random.PRNGKey(0)
    key, kx = jax.random.split(key)

    # Small, shape-consistent input: batch of 8 MNIST-style images (NCHW); the wrapper
    # flattens exactly like `x.view(-1, 28*28)` in the PyTorch module.
    x_img = jax.random.normal(kx, (8, 1, 28, 28), jnp.float32)

    params = init_params(key)
    prepared = prepare_params(params)          # one-time weight pad + bf16 cast

    out = deep_nn_forward(x_img, prepared)     # tiny batch -> single 16-row tile
    out = jax.block_until_ready(out)

    # sanity check vs plain-JAX f32 reference (looser tol: bf16 weight/activation quantization)
    ref = reference_forward(x_img.reshape(-1, IN_FEATURES), params)
    assert out.shape == (8, OUT_FEATURES)
    assert jnp.allclose(out, ref, atol=5e-2, rtol=5e-2), "mismatch vs reference"

    print("KERNEL_OK")
</pallas_src>

<mosaic_0001>
module attributes {stable_mosaic.version = 11 : i64} {
  func.func @_mlp_kernel(%arg0: i32, %arg1: memref<16x784xf32, #tpu.memory_space<vmem>>, %arg2: memref<784x512xbf16, #tpu.memory_space<vmem>>, %arg3: memref<1x512xf32, #tpu.memory_space<vmem>>, %arg4: memref<512x256xbf16, #tpu.memory_space<vmem>>, %arg5: memref<1x256xf32, #tpu.memory_space<vmem>>, %arg6: memref<256x128xbf16, #tpu.memory_space<vmem>>, %arg7: memref<1x128xf32, #tpu.memory_space<vmem>>, %arg8: memref<128x128xbf16, #tpu.memory_space<vmem>>, %arg9: memref<1x128xf32, #tpu.memory_space<vmem>>, %arg10: memref<128x128xbf16, #tpu.memory_space<vmem>>, %arg11: memref<1x128xf32, #tpu.memory_space<vmem>>, %arg12: memref<16x128xbf16, #tpu.memory_space<vmem>>) attributes {dimension_semantics = [#tpu.dimension_semantics<parallel>], iteration_bounds = array<i64: 1>, scalar_prefetch = 0 : i64, scratch_operands = 0 : i64, tpu.core_type = #tpu.core_type<tc>, window_params = [{transform_indices = @transform_0, window_bounds = array<i64: 16, 784>}, {pipeline_mode = #tpu.pipeline_mode<synchronous>, transform_indices = @transform_1, window_bounds = array<i64: 784, 512>}, {pipeline_mode = #tpu.pipeline_mode<synchronous>, transform_indices = @transform_2, window_bounds = array<i64: 1, 512>}, {pipeline_mode = #tpu.pipeline_mode<synchronous>, transform_indices = @transform_3, window_bounds = array<i64: 512, 256>}, {pipeline_mode = #tpu.pipeline_mode<synchronous>, transform_indices = @transform_4, window_bounds = array<i64: 1, 256>}, {pipeline_mode = #tpu.pipeline_mode<synchronous>, transform_indices = @transform_5, window_bounds = array<i64: 256, 128>}, {pipeline_mode = #tpu.pipeline_mode<synchronous>, transform_indices = @transform_6, window_bounds = array<i64: 1, 128>}, {pipeline_mode = #tpu.pipeline_mode<synchronous>, transform_indices = @transform_7, window_bounds = array<i64: 128, 128>}, {pipeline_mode = #tpu.pipeline_mode<synchronous>, transform_indices = @transform_8, window_bounds = array<i64: 1, 128>}, {pipeline_mode = #tpu.pipeline_mode<synchronous>, transform_indices = @transform_9, window_bounds = array<i64: 128, 128>}, {pipeline_mode = #tpu.pipeline_mode<synchronous>, transform_indices = @transform_10, window_bounds = array<i64: 1, 128>}, {transform_indices = @transform_11, window_bounds = array<i64: 16, 128>}]} {
    %c0 = arith.constant 0 : index
    %c0_0 = arith.constant 0 : index
    %0 = vector.load %arg1[%c0, %c0_0] : memref<16x784xf32, #tpu.memory_space<vmem>>, vector<16x784xf32>
    %1 = arith.truncf %0 : vector<16x784xf32> to vector<16x784xbf16>
    %c0_1 = arith.constant 0 : index
    %c0_2 = arith.constant 0 : index
    %2 = vector.load %arg2[%c0_1, %c0_2] : memref<784x512xbf16, #tpu.memory_space<vmem>>, vector<784x512xbf16>
    %cst = arith.constant dense<0.000000e+00> : vector<16x512xf32>
    %3 = tpu.matmul %1, %2, %cst {dimension_numbers = #tpu.dot_dimension_numbers<[1], [0], [0], [1], [0, 0, 1, 1], [], []>} : vector<16x784xbf16>, vector<784x512xbf16>, vector<16x512xf32> -> vector<16x512xf32>
    %c0_3 = arith.constant 0 : index
    %c0_4 = arith.constant 0 : index
    %4 = vector.load %arg3[%c0_3, %c0_4] : memref<1x512xf32, #tpu.memory_space<vmem>>, vector<1x512xf32>
    %5 = vector.broadcast %4 : vector<1x512xf32> to vector<16x512xf32>
    %6 = arith.addf %3, %5 : vector<16x512xf32>
    %cst_5 = arith.constant 0.000000e+00 : f32
    %7 = vector.broadcast %cst_5 : f32 to vector<16x512xf32>
    %8 = arith.maximumf %6, %7 : vector<16x512xf32>
    %9 = arith.truncf %8 : vector<16x512xf32> to vector<16x512xbf16>
    %c0_6 = arith.constant 0 : index
    %c0_7 = arith.constant 0 : index
    %10 = vector.load %arg4[%c0_6, %c0_7] : memref<512x256xbf16, #tpu.memory_space<vmem>>, vector<512x256xbf16>
    %cst_8 = arith.constant dense<0.000000e+00> : vector<16x256xf32>
    %11 = tpu.matmul %9, %10, %cst_8 {dimension_numbers = #tpu.dot_dimension_numbers<[1], [0], [0], [1], [0, 0, 1, 1], [], []>} : vector<16x512xbf16>, vector<512x256xbf16>, vector<16x256xf32> -> vector<16x256xf32>
    %c0_9 = arith.constant 0 : index
    %c0_10 = arith.constant 0 : index
    %12 = vector.load %arg5[%c0_9, %c0_10] : memref<1x256xf32, #tpu.memory_space<vmem>>, vector<1x256xf32>
    %13 = vector.broadcast %12 : vector<1x256xf32> to vector<16x256xf32>
    %14 = arith.addf %11, %13 : vector<16x256xf32>
    %cst_11 = arith.constant 0.000000e+00 : f32
    %15 = vector.broadcast %cst_11 : f32 to vector<16x256xf32>
    %16 = arith.maximumf %14, %15 : vector<16x256xf32>
    %17 = arith.truncf %16 : vector<16x256xf32> to vector<16x256xbf16>
    %c0_12 = arith.constant 0 : index
    %c0_13 = arith.constant 0 : index
    %18 = vector.load %arg6[%c0_12, %c0_13] : memref<256x128xbf16, #tpu.memory_space<vmem>>, vector<256x128xbf16>
    %cst_14 = arith.constant dense<0.000000e+00> : vector<16x128xf32>
    %19 = tpu.matmul %17, %18, %cst_14 {dimension_numbers = #tpu.dot_dimension_numbers<[1], [0], [0], [1], [0, 0, 1, 1], [], []>} : vector<16x256xbf16>, vector<256x128xbf16>, vector<16x128xf32> -> vector<16x128xf32>
    %c0_15 = arith.constant 0 : index
    %c0_16 = arith.constant 0 : index
    %20 = vector.load %arg7[%c0_15, %c0_16] : memref<1x128xf32, #tpu.memory_space<vmem>>, vector<1x128xf32>
    %21 = vector.broadcast %20 : vector<1x128xf32> to vector<16x128xf32>
    %22 = arith.addf %19, %21 : vector<16x128xf32>
    %cst_17 = arith.constant 0.000000e+00 : f32
    %23 = vector.broadcast %cst_17 : f32 to vector<16x128xf32>
    %24 = arith.maximumf %22, %23 : vector<16x128xf32>
    %25 = arith.truncf %24 : vector<16x128xf32> to vector<16x128xbf16>
    %c0_18 = arith.constant 0 : index
    %c0_19 = arith.constant 0 : index
    %26 = vector.load %arg8[%c0_18, %c0_19] : memref<128x128xbf16, #tpu.memory_space<vmem>>, vector<128x128xbf16>
    %cst_20 = arith.constant dense<0.000000e+00> : vector<16x128xf32>
    %27 = tpu.matmul %25, %26, %cst_20 {dimension_numbers = #tpu.dot_dimension_numbers<[1], [0], [0], [1], [0, 0, 1, 1], [], []>} : vector<16x128xbf16>, vector<128x128xbf16>, vector<16x128xf32> -> vector<16x128xf32>
    %c0_21 = arith.constant 0 : index
    %c0_22 = arith.constant 0 : index
    %28 = vector.load %arg9[%c0_21, %c0_22] : memref<1x128xf32, #tpu.memory_space<vmem>>, vector<1x128xf32>
    %29 = vector.broadcast %28 : vector<1x128xf32> to vector<16x128xf32>
    %30 = arith.addf %27, %29 : vector<16x128xf32>
    %cst_23 = arith.constant 0.000000e+00 : f32
    %31 = vector.broadcast %cst_23 : f32 to vector<16x128xf32>
    %32 = arith.maximumf %30, %31 : vector<16x128xf32>
    %33 = arith.truncf %32 : vector<16x128xf32> to vector<16x128xbf16>
    %c0_24 = arith.constant 0 : index
    %c0_25 = arith.constant 0 : index
    %34 = vector.load %arg10[%c0_24, %c0_25] : memref<128x128xbf16, #tpu.memory_space<vmem>>, vector<128x128xbf16>
    %cst_26 = arith.constant dense<0.000000e+00> : vector<16x128xf32>
    %35 = tpu.matmul %33, %34, %cst_26 {dimension_numbers = #tpu.dot_dimension_numbers<[1], [0], [0], [1], [0, 0, 1, 1], [], []>} : vector<16x128xbf16>, vector<128x128xbf16>, vector<16x128xf32> -> vector<16x128xf32>
    %c0_27 = arith.constant 0 : index
    %c0_28 = arith.constant 0 : index
    %36 = vector.load %arg11[%c0_27, %c0_28] : memref<1x128xf32, #tpu.memory_space<vmem>>, vector<1x128xf32>
    %37 = vector.broadcast %36 : vector<1x128xf32> to vector<16x128xf32>
    %38 = arith.addf %35, %37 : vector<16x128xf32>
    %39 = arith.truncf %38 : vector<16x128xf32> to vector<16x128xbf16>
    %c0_29 = arith.constant 0 : index
    %c0_30 = arith.constant 0 : index
    %40 = vector.load %arg12[%c0_29, %c0_30] : memref<16x128xbf16, #tpu.memory_space<vmem>>, vector<16x128xbf16>
    tpu.vector_store %arg12[%c0_29, %c0_30], %39 {strides = array<i32>} : memref<16x128xbf16, #tpu.memory_space<vmem>>, vector<16x128xbf16>,
    return
  }
  func.func @transform_0(%arg0: i32) -> (i32, i32) {
    %c0_i32 = arith.constant 0 : i32
    %c0_i32_0 = arith.constant 0 : i32
    return %arg0, %c0_i32 : i32, i32
  }
  func.func @transform_1(%arg0: i32) -> (i32, i32) {
    %c0_i32 = arith.constant 0 : i32
    %c0_i32_0 = arith.constant 0 : i32
    %c0_i32_1 = arith.constant 0 : i32
    return %c0_i32, %c0_i32_0 : i32, i32
  }
  func.func @transform_2(%arg0: i32) -> (i32, i32) {
    %c0_i32 = arith.constant 0 : i32
    %c0_i32_0 = arith.constant 0 : i32
    %c0_i32_1 = arith.constant 0 : i32
    return %c0_i32, %c0_i32_0 : i32, i32
  }
  func.func @transform_3(%arg0: i32) -> (i32, i32) {
    %c0_i32 = arith.constant 0 : i32
    %c0_i32_0 = arith.constant 0 : i32
    %c0_i32_1 = arith.constant 0 : i32
    return %c0_i32, %c0_i32_0 : i32, i32
  }
  func.func @transform_4(%arg0: i32) -> (i32, i32) {
    %c0_i32 = arith.constant 0 : i32
    %c0_i32_0 = arith.constant 0 : i32
    %c0_i32_1 = arith.constant 0 : i32
    return %c0_i32, %c0_i32_0 : i32, i32
  }
  func.func @transform_5(%arg0: i32) -> (i32, i32) {
    %c0_i32 = arith.constant 0 : i32
    %c0_i32_0 = arith.constant 0 : i32
    %c0_i32_1 = arith.constant 0 : i32
    return %c0_i32, %c0_i32_0 : i32, i32
  }
  func.func @transform_6(%arg0: i32) -> (i32, i32) {
    %c0_i32 = arith.constant 0 : i32
    %c0_i32_0 = arith.constant 0 : i32
    %c0_i32_1 = arith.constant 0 : i32
    return %c0_i32, %c0_i32_0 : i32, i32
  }
  func.func @transform_7(%arg0: i32) -> (i32, i32) {
    %c0_i32 = arith.constant 0 : i32
    %c0_i32_0 = arith.constant 0 : i32
    %c0_i32_1 = arith.constant 0 : i32
    return %c0_i32, %c0_i32_0 : i32, i32
  }
  func.func @transform_8(%arg0: i32) -> (i32, i32) {
    %c0_i32 = arith.constant 0 : i32
    %c0_i32_0 = arith.constant 0 : i32
    %c0_i32_1 = arith.constant 0 : i32
    return %c0_i32, %c0_i32_0 : i32, i32
  }
  func.func @transform_9(%arg0: i32) -> (i32, i32) {
    %c0_i32 = arith.constant 0 : i32
    %c0_i32_0 = arith.constant 0 : i32
    %c0_i32_1 = arith.constant 0 : i32
    return %c0_i32, %c0_i32_0 : i32, i32
  }
  func.func @transform_10(%arg0: i32) -> (i32, i32) {
    %c0_i32 = arith.constant 0 : i32
    %c0_i32_0 = arith.constant 0 : i32
    %c0_i32_1 = arith.constant 0 : i32
    return %c0_i32, %c0_i32_0 : i32, i32
  }
  func.func @transform_11(%arg0: i32) -> (i32, i32) {
    %c0_i32 = arith.constant 0 : i32
    %c0_i32_0 = arith.constant 0 : i32
    return %arg0, %c0_i32 : i32, i32
  }
}

</mosaic_0001>

<bundles_post_ra>
// kernel: tpu_custom_call.1
= control target key start
LH: loop header
LB: loop body
LE: loop exit
PB: predicated region body
PF: predicated region fallthrough
CT: control target
= control target key end

     0   :  { %16 = vsyncpa [#allocation3], 0  ;;  %s3905_s0 = inlined_call_operand.hbm [shape: f32[16,784], index: 0, kind: input, shape index: {}]   ;;  %s3906_s1 = inlined_call_operand.hbm [shape: bf16[784,512], index: 1, kind: input, shape index: {}]   ;;  %s3907_s2 = inlined_call_operand.vmem [shape: f32[1,512], index: 2, kind: input, shape index: {}]   ;;  %s3908_s3 = inlined_call_operand.hbm [shape: bf16[512,256], index: 3, kind: input, shape index: {}]   ;;  %s3909_s4 = inlined_call_operand.vmem [shape: f32[1,256], index: 4, kind: input, shape index: {}]   ;;  %s3910_s5 = inlined_call_operand.hbm [shape: bf16[256,128], index: 5, kind: input, shape index: {}]   ;;  %s3911_s6 = inlined_call_operand.vmem [shape: f32[1,128], index: 6, kind: input, shape index: {}]   ;;  %s3912_s7 = inlined_call_operand.hbm [shape: bf16[128,128], index: 7, kind: input, shape index: {}]   ;;  %s3913_s8 = inlined_call_operand.vmem [shape: f32[1,128], index: 8, kind: input, shape index: {}]   ;;  %s3914_s9 = inlined_call_operand.hbm [shape: bf16[128,128], index: 9, kind: input, shape index: {}]   ;;  %s3915_s10 = inlined_call_operand.vmem [shape: f32[1,128], index: 10, kind: input, shape index: {}]   ;;  %s3916_s11 = inlined_call_operand.hbm [shape: bf16[16,128], index: 11, kind: output, shape index: {}]  }
   0x1   :  { %17 = vsyncpa [#allocation6], 0 }
   0x2   :  { %18 = vsyncpa [#allocation9], 0 }
   0x3   :  { %19 = vsyncpa [#allocation12], 0 }
   0x4   :  { %20 = vsyncpa [#allocation4], 0  ;;  %s3655_s17 = smov [#allocation5]   ;;  %s3491_s21 = scalar_lea.hbm %s3906_s1, 25088 }
   0x5   :  { %s38_s18 = sshll.u32 %s3655_s17, 4  ;;  %p3492_p0 = scmp.ne.s32.totalorder %s3906_s1, %s3491_s21  ;;  %s39_s18 = int_to_ptr.vmem [resolvable:$true] %s38_s18 }
   0x6   :  { %p3495_p1 = scmp.lt.u32.totalorder %s3491_s21, %s3906_s1 }
   0x8   :  { %p3497_p2 = pnand %p3495_p1, %p3492_p0 }
   0xa   :  { %3500 = shalt.err (!%p3497_p2)
}
   0xb   :  { %s3501_s26 = scalar_lea.vmem %s39_s18, 25088  ;;  %p3506_p4 = scmp.lt.s32.totalorder %s39_s18, %s39_s18 }
   0xc   :  { %p3502_p3 = scmp.ne.s32.totalorder %s39_s18, %s3501_s26  ;;  %p3507_p5 = scmp.lt.s32.totalorder %s3501_s26, %s3501_s26 }
   0xe   :  { %p3508_p6 = por %p3507_p5, %p3506_p4 }
  0x10   :  { %p3509_p7 = pnand %p3508_p6, %p3502_p3 }
  0x12   :  { %3512 = shalt.err (!%p3509_p7)
}
  0x13   :  { %s3656_s27 = smov 256   ;;  %s3657_s28 = smov 16  }
  0x14   :  { %44 = dma.hbm_to_vmem [thread:$0]  %s3906_s1, 25088, %s39_s18, [#allocation6], %s3656_s27, %s3656_s27, %s3657_s28  }
  0x15   :  { %s3658_s12 = smov [#allocation8]   ;;  %s3513_s16 = scalar_lea.hbm %s3910_s5, 2048 }
  0x16   :  { %s66_s13 = sshll.u32 %s3658_s12, 4  ;;  %p3514_p8 = scmp.ne.s32.totalorder %s3910_s5, %s3513_s16  ;;  %s67_s13 = int_to_ptr.vmem [resolvable:$true] %s66_s13 }
  0x17   :  { %p3517_p9 = scmp.lt.u32.totalorder %s3513_s16, %s3910_s5 }
  0x19   :  { %p3519_p10 = pnand %p3517_p9, %p3514_p8 }
  0x1b   :  { %3522 = shalt.err (!%p3519_p10)
}
  0x1c   :  { %s3523_s22 = scalar_lea.vmem %s67_s13, 2048  ;;  %p3528_p12 = scmp.lt.s32.totalorder %s67_s13, %s67_s13 }
  0x1d   :  { %p3524_p11 = scmp.ne.s32.totalorder %s67_s13, %s3523_s22  ;;  %p3529_p13 = scmp.lt.s32.totalorder %s3523_s22, %s3523_s22 }
  0x1f   :  { %p3530_p0 = por %p3529_p13, %p3528_p12 }
  0x21   :  { %p3531_p1 = pnand %p3530_p0, %p3524_p11 }
  0x23   :  { %3534 = shalt.err (!%p3531_p1)
}
  0x24   :  { %s3659_s1 = smov 64   ;;  %s3660_s18 = smov 4  }
  0x25   :  { %72 = dma.hbm_to_vmem [thread:$0]  %s3910_s5, 2048, %s67_s13, [#allocation9], %s3659_s1, %s3659_s1, %s3660_s18  }
  0x26   :  { %s3661_s25 = smov [#allocation2]   ;;  %s3535_s29 = scalar_lea.hbm %s3905_s0, 1792 }
  0x27   :  { %s26_s26 = sshll.u32 %s3661_s25, 4  ;;  %p3536_p2 = scmp.ne.s32.totalorder %s3905_s0, %s3535_s29  ;;  %s27_s26 = int_to_ptr.vmem [resolvable:$true] %s26_s26 }
  0x28   :  { %p3539_p3 = scmp.lt.u32.totalorder %s3535_s29, %s3905_s0 }
  0x2a   :  { %p3541_p4 = pnand %p3539_p3, %p3536_p2 }
  0x2c   :  { %3544 = shalt.err (!%p3541_p4)
}
  0x2d   :  { %s3545_s16 = scalar_lea.vmem %s27_s26, 1792  ;;  %p3550_p6 = scmp.lt.s32.totalorder %s27_s26, %s27_s26 }
  0x2e   :  { %p3546_p5 = scmp.ne.s32.totalorder %s27_s26, %s3545_s16  ;;  %p3551_p7 = scmp.lt.s32.totalorder %s3545_s16, %s3545_s16 }
  0x30   :  { %p3552_p8 = por %p3551_p7, %p3550_p6 }
  0x32   :  { %p3553_p9 = pnand %p3552_p8, %p3546_p5 }
  0x34   :  { %3556 = shalt.err (!%p3553_p9)
}
  0x35   :  { %s3662_s5 = smov 896   ;;  %s3663_s13 = smov 56  }
  0x36   :  { %32 = dma.hbm_to_vmem [thread:$0]  %s3905_s0, 1792, %s27_s26, [#allocation3], %s3662_s5, %s3662_s5, %s3663_s13  }
  0x37   :  { %s3664_s20 = smov [#allocation7]   ;;  %s3557_s24 = scalar_lea.hbm %s3908_s3, 8192 }
  0x38   :  { %s52_s21 = sshll.u32 %s3664_s20, 4  ;;  %p3558_p10 = scmp.ne.s32.totalorder %s3908_s3, %s3557_s24  ;;  %s53_s21 = int_to_ptr.vmem [resolvable:$true] %s52_s21 }
  0x39   :  { %p3561_p11 = scmp.lt.u32.totalorder %s3557_s24, %s3908_s3 }
  0x3b   :  { %p3563_p12 = pnand %p3561_p11, %p3558_p10 }
  0x3d   :  { %3566 = shalt.err (!%p3563_p12)
}
  0x3e   :  { %s3567_s30 = scalar_lea.vmem %s53_s21, 8192  ;;  %p3572_p0 = scmp.lt.s32.totalorder %s53_s21, %s53_s21 }
  0x3f   :  { %p3568_p13 = scmp.ne.s32.totalorder %s53_s21, %s3567_s30  ;;  %p3573_p1 = scmp.lt.s32.totalorder %s3567_s30, %s3567_s30 }
  0x41   :  { %p3574_p2 = por %p3573_p1, %p3572_p0 }
  0x43   :  { %p3575_p3 = pnand %p3574_p2, %p3568_p13 }
  0x45   :  { %3578 = shalt.err (!%p3575_p3)
}
  0x46   :  { %s3665_s0 = smov 128   ;;  %s3666_s26 = smov 8  }
  0x47   :  { %58 = dma.hbm_to_vmem [thread:$0]  %s3908_s3, 8192, %s53_s21, [#allocation6], %s3665_s0, %s3665_s0, %s3666_s26  }
  0x48   :  { %s3667_s15 = smov [#allocation10]   ;;  %s3668_s5 = smov [#allocation11]  }
  0x49   :  { %s80_s16 = sshll.u32 %s3667_s15, 4  ;;  %s94_s13 = sshll.u32 %s3668_s5, 4  ;;  %s81_s16 = int_to_ptr.vmem [resolvable:$true] %s80_s16  ;;  %s3784_s13 = int_to_ptr.vmem [resolvable:$true] %s94_s13 }
  0x4a   :  { %s3579_s20 = scalar_lea.hbm %s3912_s7, 1024 }
  0x4b   :  { %p3580_p4 = scmp.ne.s32.totalorder %s3912_s7, %s3579_s20  ;;  %p3583_p5 = scmp.lt.u32.totalorder %s3579_s20, %s3912_s7 }
  0x4d   :  { %p3585_p6 = pnand %p3583_p5, %p3580_p4 }
  0x4f   :  { %3588 = shalt.err (!%p3585_p6)
}
  0x50   :  { %s3589_s3 = scalar_lea.vmem %s81_s16, 1024  ;;  %p3594_p8 = scmp.lt.s32.totalorder %s81_s16, %s81_s16 }
  0x51   :  { %p3590_p7 = scmp.ne.s32.totalorder %s81_s16, %s3589_s3  ;;  %p3595_p9 = scmp.lt.s32.totalorder %s3589_s3, %s3589_s3 }
  0x53   :  { %p3596_p10 = por %p3595_p9, %p3594_p8 }
  0x55   :  { %p3597_p11 = pnand %p3596_p10, %p3590_p7 }
  0x57   :  { %3600 = shalt.err (!%p3597_p11)
}
  0x58   :  { %86 = dma.hbm_to_vmem [thread:$0]  %s3912_s7, 1024, %s81_s16, [#allocation9], %s3659_s1, %s3659_s1, %s3660_s18  }
  0x59   :  { %s3601_s30 = scalar_lea.hbm %s3914_s9, 1024 }
  0x5a   :  { %p3602_p12 = scmp.ne.s32.totalorder %s3914_s9, %s3601_s30  ;;  %p3605_p13 = scmp.lt.u32.totalorder %s3601_s30, %s3914_s9 }
  0x5c   :  { %p3607_p0 = pnand %p3605_p13, %p3602_p12 }
  0x5e   :  { %3610 = shalt.err (!%p3607_p0)
}
  0x5f   :  { %s3611_s15 = scalar_lea.vmem %s3784_s13, 1024  ;;  %p3616_p2 = scmp.lt.s32.totalorder %s3784_s13, %s3784_s13 }
  0x60   :  { %p3612_p1 = scmp.ne.s32.totalorder %s3784_s13, %s3611_s15  ;;  %p3617_p3 = scmp.lt.s32.totalorder %s3611_s15, %s3611_s15 }
  0x62   :  { %p3618_p4 = por %p3617_p3, %p3616_p2 }
  0x64   :  { %p3619_p5 = pnand %p3618_p4, %p3612_p1 }
  0x66   :  { %3622 = shalt.err (!%p3619_p5)
}
  0x67   :  { %100 = dma.hbm_to_vmem [thread:$0]  %s3914_s9, 1024, %s3784_s13, [#allocation12], %s3659_s1, %s3659_s1, %s3660_s18  }
  0x68   :  { %3645 = dma.done.wait [#allocation3], 1792  }
  0x69   :  { %3646 = vsyncadd [#allocation3], 4294965504 }
  0x6a   :  { %3647 = dma.done.wait [#allocation6], 33280  }
  0x6b   :  { %3648 = vsyncadd [#allocation6], 4294934016 }
  0x6c   :  { %3649 = dma.done.wait [#allocation9], 3072  }
  0x6d   :  { %3650 = vsyncadd [#allocation9], 4294964224 }
  0x6e   :  { %3651 = dma.done.wait [#allocation12], 1024  }
  0x6f   :  { %3652 = vsyncadd [#allocation12], 4294966272  ;;  %v3669_v0 = vmov 0   ;;  %v3069_v1 = vld [vmem:[#allocation5 + $0x4] ss:$16 sps:$4 sm:$0xff]   ;;  %v135_v10 = vld [vmem:[#allocation2 + $0x68] sm:$0xff] }
  0x70   :  { %1506 = vmatprep.mubr.bf16.mxu1 %v3669_v0  ;;  %v3071_v2 = vld [vmem:[#allocation5 + $0x604] ss:$16 sps:$4 sm:$0xff]   ;;  %1345 = vmatprep.subr.bf16.mxu0 %v3069_v1  ;;  %v3073_v3 = vld [vmem:[#allocation5] ss:$16 sps:$4 sm:$0xff]   ;;  %v3077_v6 = vld [vmem:[#allocation5 + $0x8] ss:$16 sps:$4 sm:$0xff]  }
  0x71   :  { %v3074_v4 = vld [vmem:[#allocation5 + $0x600] ss:$16 sps:$4 sm:$0xff]   ;;  %1474 = vmatprep.subr.bf16.mxu1 %v3071_v2  ;;  %v3075_v5 = vld [vmem:[#allocation5 + $0x24] ss:$16 sps:$4 sm:$0xff]   ;;  %1346 = vmatpush1.bf16.msra.mxu0 %v3073_v3  ;;  %v3079_v7 = vld [vmem:[#allocation5 + $0xc] ss:$16 sps:$4 sm:$0xff]  }
  0x72   :  { %1475 = vmatpush1.bf16.msra.mxu1 %v3074_v4  ;;  %1347 = vmatprep.subr.bf16.mxu0 %v3075_v5  ;;  %v3080_v8 = vld [vmem:[#allocation5 + $0x20] ss:$16 sps:$4 sm:$0xff]   ;;  %vm1341_vm0 = vcmask 130048   ;;  %v3081_v12 = vld [vmem:[#allocation5 + $0x44] ss:$16 sps:$4 sm:$0xff]   ;;  %v123_v51 = vld [vmem:[#allocation2 + $0x8] sm:$0xff] }
  0x73   :  { %v128_v9 = vld [vmem:[#allocation2 + $0x30] sm:$0xff]  ;;  %1517 = vmatprep.subr.bf16.mxu1 %v3079_v7  ;;  %v3083_v13 = vld [vmem:[#allocation5 + $0x28] ss:$16 sps:$4 sm:$0xff]   ;;  %v3085_v14 = vld [vmem:[#allocation5 + $0x2c] ss:$16 sps:$4 sm:$0xff]   ;;  %vm3671_vm1 = vmmov 0  }
  0x74   :  { %v3822_v11 = vpack.c.bf16 %v135_v10, %v128_v9  ;;  %v3086_v15 = vld [vmem:[#allocation5 + $0x40] ss:$16 sps:$4 sm:$0xff]   ;;  %v3087_v16 = vld [vmem:[#allocation5 + $0x64] ss:$16 sps:$4 sm:$0xff]   ;;  %v3091_v17 = vld [vmem:[#allocation5 + $0x4c] ss:$16 sps:$4 sm:$0xff]  }
  0x75   :  { %1348 = vmatpush1.bf16.msra.mxu0 %v3080_v8  ;;  %v3092_v18 = vld [vmem:[#allocation5 + $0x60] ss:$16 sps:$4 sm:$0xff]   ;;  %v3089_v19 = vld [vmem:[#allocation5 + $0x48] ss:$16 sps:$4 sm:$0xff]   ;;  %v3093_v20 = vld [vmem:[#allocation5 + $0x84] ss:$16 sps:$4 sm:$0xff]  }
  0x76   :  { %2821 = vmatmul.mubr.msk.bf16.vlgmr.msra.gmra.mrb[0].mxu1 %vm1341_vm0, %v3822_v11  ;;  %1349 = vmatprep.subr.bf16.mxu0 %v3081_v12  ;;  %v3097_v21 = vld [vmem:[#allocation5 + $0x6c] ss:$16 sps:$4 sm:$0xff]   ;;  %v3095_v22 = vld [vmem:[#allocation5 + $0x68] ss:$16 sps:$4 sm:$0xff]   ;;  %v3098_v23 = vld [vmem:[#allocation5 + $0x80] ss:$16 sps:$4 sm:$0xff]  }
  0x77   :  { %1518 = vmatpush1.bf16.msra.mxu1 %v3077_v6  ;;  %v3099_v24 = vld [vmem:[#allocation5 + $0xa4] ss:$16 sps:$4 sm:$0xff]   ;;  %v3103_v25 = vld [vmem:[#allocation5 + $0x8c] ss:$16 sps:$4 sm:$0xff]   ;;  %v3104_v26 = vld [vmem:[#allocation5 + $0xa0] ss:$16 sps:$4 sm:$0xff]  }
  0x78   :  { %1519 = vmatprep.subr.bf16.mxu1 %v3085_v14  ;;  %v3101_v27 = vld [vmem:[#allocation5 + $0x88] ss:$16 sps:$4 sm:$0xff]   ;;  %v3105_v28 = vld [vmem:[#allocation5 + $0xc4] ss:$16 sps:$4 sm:$0xff]   ;;  %v3109_v29 = vld [vmem:[#allocation5 + $0xac] ss:$16 sps:$4 sm:$0xff]  }
  0x79   :  { %1350 = vmatpush1.bf16.msra.mxu0 %v3086_v15  ;;  %v3107_v30 = vld [vmem:[#allocation5 + $0xa8] ss:$16 sps:$4 sm:$0xff]   ;;  %v3110_v31 = vld [vmem:[#allocation5 + $0xc0] ss:$16 sps:$4 sm:$0xff]   ;;  %v3111_v32 = vld [vmem:[#allocation5 + $0xe4] ss:$16 sps:$4 sm:$0xff]  }
  0x7a   :  { %1351 = vmatprep.subr.bf16.mxu0 %v3087_v16  ;;  %v3115_v33 = vld [vmem:[#allocation5 + $0xcc] ss:$16 sps:$4 sm:$0xff]   ;;  %v3116_v34 = vld [vmem:[#allocation5 + $0xe0] ss:$16 sps:$4 sm:$0xff]   ;;  %v3113_v35 = vld [vmem:[#allocation5 + $0xc8] ss:$16 sps:$4 sm:$0xff]  }
  0x7b   :  { %1520 = vmatpush1.bf16.msra.mxu1 %v3083_v13  ;;  %v3117_v36 = vld [vmem:[#allocation5 + $0x104] ss:$16 sps:$4 sm:$0xff]   ;;  %v3121_v37 = vld [vmem:[#allocation5 + $0xec] ss:$16 sps:$4 sm:$0xff]   ;;  %v3119_v38 = vld [vmem:[#allocation5 + $0xe8] ss:$16 sps:$4 sm:$0xff]  }
  0x7c   :  { %1521 = vmatprep.subr.bf16.mxu1 %v3091_v17  ;;  %v3122_v39 = vld [vmem:[#allocation5 + $0x100] ss:$16 sps:$4 sm:$0xff]   ;;  %v3123_v40 = vld [vmem:[#allocation5 + $0x124] ss:$16 sps:$4 sm:$0xff]   ;;  %v3127_v41 = vld [vmem:[#allocation5 + $0x10c] ss:$16 sps:$4 sm:$0xff]  }
  0x7d   :  { %1352 = vmatpush1.bf16.msra.mxu0 %v3092_v18  ;;  %v3128_v42 = vld [vmem:[#allocation5 + $0x120] ss:$16 sps:$4 sm:$0xff]   ;;  %v3125_v43 = vld [vmem:[#allocation5 + $0x108] ss:$16 sps:$4 sm:$0xff]   ;;  %v3129_v44 = vld [vmem:[#allocation5 + $0x144] ss:$16 sps:$4 sm:$0xff]  }
  0x7e   :  { %1353 = vmatprep.subr.bf16.mxu0 %v3093_v20  ;;  %v3133_v45 = vld [vmem:[#allocation5 + $0x12c] ss:$16 sps:$4 sm:$0xff]   ;;  %v3131_v46 = vld [vmem:[#allocation5 + $0x128] ss:$16 sps:$4 sm:$0xff]   ;;  %v3134_v47 = vld [vmem:[#allocation5 + $0x140] ss:$16 sps:$4 sm:$0xff]  }
  0x7f   :  { %1522 = vmatpush1.bf16.msra.mxu1 %v3089_v19  ;;  %v3135_v48 = vld [vmem:[#allocation5 + $0x164] ss:$16 sps:$4 sm:$0xff]   ;;  %v3139_v49 = vld [vmem:[#allocation5 + $0x14c] ss:$16 sps:$4 sm:$0xff]   ;;  %v3137_v50 = vld [vmem:[#allocation5 + $0x148] ss:$16 sps:$4 sm:$0xff]  }
  0x80   :  { %1523 = vmatprep.subr.bf16.mxu1 %v3097_v21  ;;  %v130_v52 = vld [vmem:[#allocation2 + $0x40] sm:$0xff]  ;;  %v3145_v56 = vld [vmem:[#allocation5 + $0x16c] ss:$16 sps:$4 sm:$0xff]   ;;  %v3143_v58 = vld [vmem:[#allocation5 + $0x168] ss:$16 sps:$4 sm:$0xff]   ;;  %s3672_s23 = smov [#allocation13]  }
  0x81   :  { %1354 = vmatpush1.bf16.msra.mxu0 %v3098_v23  ;;  %v3140_v53 = vld [vmem:[#allocation5 + $0x160] ss:$16 sps:$4 sm:$0xff]   ;;  %v137_v54 = vpack.c.bf16 %v130_v52, %v123_v51  ;;  %v3141_v55 = vld [vmem:[#allocation5 + $0x184] ss:$16 sps:$4 sm:$0xff]   ;;  %v3151_v60 = vld [vmem:[#allocation5 + $0x18c] ss:$16 sps:$4 sm:$0xff]  }
  0x82   :  { %1355 = vmatprep.subr.bf16.mxu0 %v3099_v24  ;;  %v3146_v57 = vld [vmem:[#allocation5 + $0x180] ss:$16 sps:$4 sm:$0xff]   ;;  %v3147_v59 = vld [vmem:[#allocation5 + $0x1a4] ss:$16 sps:$4 sm:$0xff]   ;;  %v3149_v62 = vld [vmem:[#allocation5 + $0x188] ss:$16 sps:$4 sm:$0xff]  }
  0x83   :  { %1524 = vmatpush1.bf16.msra.mxu1 %v3095_v22  ;;  %1377 = vmatprep.mubr.bf16.mxu0 %v137_v54  ;;  %v3152_v61 = vld [vmem:[#allocation5 + $0x1a0] ss:$16 sps:$4 sm:$0xff]   ;;  %v3153_v63 = vld [vmem:[#allocation5 + $0x1c4] ss:$16 sps:$4 sm:$0xff]   ;;  %v3157_v1 = vld [vmem:[#allocation5 + $0x1ac] ss:$16 sps:$4 sm:$0xff]  }
  0x84   :  { %1525 = vmatprep.subr.bf16.mxu1 %v3103_v25  ;;  %1549 = vmatprep.mubr.bf16.mxu1 %v137_v54  ;;  %v3158_v2 = vld [vmem:[#allocation5 + $0x1c0] ss:$16 sps:$4 sm:$0xff]   ;;  %v3155_v3 = vld [vmem:[#allocation5 + $0x1a8] ss:$16 sps:$4 sm:$0xff]   ;;  %v3159_v4 = vld [vmem:[#allocation5 + $0x1e4] ss:$16 sps:$4 sm:$0xff]  }
  0x85   :  { %1356 = vmatpush1.bf16.msra.mxu0 %v3104_v26  ;;  %v3163_v5 = vld [vmem:[#allocation5 + $0x1cc] ss:$16 sps:$4 sm:$0xff]   ;;  %v3164_v6 = vld [vmem:[#allocation5 + $0x1e0] ss:$16 sps:$4 sm:$0xff]   ;;  %v3161_v9 = vld [vmem:[#allocation5 + $0x1c8] ss:$16 sps:$4 sm:$0xff]  }
  0x86   :  { %1357 = vmatprep.subr.bf16.mxu0 %v3105_v28  ;;  %v122_v7 = vld [vmem:[#allocation2] sm:$0xff]  ;;  %v129_v8 = vld [vmem:[#allocation2 + $0x38] sm:$0xff]  ;;  %s2610_s24 = sshll.u32 %s3672_s23, 4  ;;  %s2611_s24 = int_to_ptr.vmem [resolvable:$true] %s2610_s24 }
  0x87   :  { %1526 = vmatpush1.bf16.msra.mxu1 %v3101_v27  ;;  %v3167_v10 = vld [vmem:[#allocation5 + $0x204] ss:$16 sps:$4 sm:$0xff]   ;;  %v3170_v12 = vld [vmem:[#allocation5 + $0x1ec] ss:$16 sps:$4 sm:$0xff]   ;;  %v136_v13 = vpack.c.bf16 %v129_v8, %v122_v7  ;;  %v3165_v14 = vld [vmem:[#allocation5 + $0x200] ss:$16 sps:$4 sm:$0xff]   ;;  %p3628_p7 = scmp.lt.s32.totalorder %s2611_s24, %s2611_s24 }
  0x88   :  { %1527 = vmatprep.subr.bf16.mxu1 %v3109_v29  ;;  %v3168_v15 = vld [vmem:[#allocation5 + $0x1e8] ss:$16 sps:$4 sm:$0xff]   ;;  %v3173_v16 = vld [vmem:[#allocation5 + $0x224] ss:$16 sps:$4 sm:$0xff]   ;;  %v3176_v17 = vld [vmem:[#allocation5 + $0x20c] ss:$16 sps:$4 sm:$0xff]  }
  0x89   :  { %1358 = vmatpush1.bf16.msra.mxu0 %v3110_v31  ;;  %v3171_v18 = vld [vmem:[#allocation5 + $0x220] ss:$16 sps:$4 sm:$0xff]   ;;  %v3174_v19 = vld [vmem:[#allocation5 + $0x208] ss:$16 sps:$4 sm:$0xff]   ;;  %v3179_v20 = vld [vmem:[#allocation5 + $0x244] ss:$16 sps:$4 sm:$0xff]  }
  0x8a   :  { %1359 = vmatprep.subr.bf16.mxu0 %v3111_v32  ;;  %v3182_v21 = vld [vmem:[#allocation5 + $0x22c] ss:$16 sps:$4 sm:$0xff]   ;;  %v3177_v22 = vld [vmem:[#allocation5 + $0x240] ss:$16 sps:$4 sm:$0xff]   ;;  %v3180_v23 = vld [vmem:[#allocation5 + $0x228] ss:$16 sps:$4 sm:$0xff]  }
  0x8b   :  { %1528 = vmatpush1.bf16.msra.mxu1 %v3107_v30  ;;  %v3185_v24 = vld [vmem:[#allocation5 + $0x264] ss:$16 sps:$4 sm:$0xff]   ;;  %v3188_v25 = vld [vmem:[#allocation5 + $0x24c] ss:$16 sps:$4 sm:$0xff]   ;;  %v3183_v26 = vld [vmem:[#allocation5 + $0x260] ss:$16 sps:$4 sm:$0xff]  }
  0x8c   :  { %1529 = vmatprep.subr.bf16.mxu1 %v3115_v33  ;;  %v3186_v27 = vld [vmem:[#allocation5 + $0x248] ss:$16 sps:$4 sm:$0xff]   ;;  %v3191_v28 = vld [vmem:[#allocation5 + $0x284] ss:$16 sps:$4 sm:$0xff]   ;;  %v3194_v29 = vld [vmem:[#allocation5 + $0x26c] ss:$16 sps:$4 sm:$0xff]  }
  0x8d   :  { %1360 = vmatpush1.bf16.msra.mxu0 %v3116_v34  ;;  %v3189_v30 = vld [vmem:[#allocation5 + $0x280] ss:$16 sps:$4 sm:$0xff]   ;;  %v3192_v31 = vld [vmem:[#allocation5 + $0x268] ss:$16 sps:$4 sm:$0xff]   ;;  %v3197_v32 = vld [vmem:[#allocation5 + $0x2a4] ss:$16 sps:$4 sm:$0xff]  }
  0x8e   :  { %1361 = vmatprep.subr.bf16.mxu0 %v3117_v36  ;;  %v3200_v33 = vld [vmem:[#allocation5 + $0x28c] ss:$16 sps:$4 sm:$0xff]   ;;  %v3195_v34 = vld [vmem:[#allocation5 + $0x2a0] ss:$16 sps:$4 sm:$0xff]   ;;  %v3203_v36 = vld [vmem:[#allocation5 + $0x2c4] ss:$16 sps:$4 sm:$0xff]  }
  0x8f   :  { %1530 = vmatpush1.bf16.msra.mxu1 %v3113_v35  ;;  %v3198_v35 = vld [vmem:[#allocation5 + $0x288] ss:$16 sps:$4 sm:$0xff]   ;;  %v3221_v51 = vld [vmem:[#allocation5 + $0x324] ss:$16 sps:$4 sm:$0xff]   ;;  %v3224_v52 = vld [vmem:[#allocation5 + $0x30c] ss:$16 sps:$4 sm:$0xff]  }
  0x90   :  { %1531 = vmatprep.subr.bf16.mxu1 %v3121_v37  ;;  %v3206_v37 = vld [vmem:[#allocation5 + $0x2ac] ss:$16 sps:$4 sm:$0xff]   ;;  %v3222_v54 = vld [vmem:[#allocation5 + $0x308] ss:$16 sps:$4 sm:$0xff]   ;;  %v3251_v8 = vld [vmem:[#allocation5 + $0x3c4] ss:$16 sps:$4 sm:$0xff]  }
  0x91   :  { %1362 = vmatpush1.bf16.msra.mxu0 %v3122_v39  ;;  %v125_v39 = vld [vmem:[#allocation2 + $0x18] sm:$0xff] }
  0x92   :  { %1363 = vmatprep.subr.bf16.mxu0 %v3123_v40  ;;  %v132_v40 = vld [vmem:[#allocation2 + $0x50] sm:$0xff]  ;;  %v3246_v7 = vld [vmem:[#allocation5 + $0x388] ss:$16 sps:$4 sm:$0xff]  }
  0x93   :  { %1532 = vmatpush1.bf16.msra.mxu1 %v3119_v38  ;;  %v3201_v38 = vld [vmem:[#allocation5 + $0x2c0] ss:$16 sps:$4 sm:$0xff]  }
  0x94   :  { %1533 = vmatprep.subr.bf16.mxu1 %v3127_v41  ;;  %v3204_v41 = vld [vmem:[#allocation5 + $0x2a8] ss:$16 sps:$4 sm:$0xff]  }
  0x95   :  { %1364 = vmatpush1.bf16.msra.mxu0 %v3128_v42  ;;  %v139_v42 = vpack.c.bf16 %v132_v40, %v125_v39  ;;  %v3287_v39 = vld [vmem:[#allocation5 + $0x484] ss:$16 sps:$4 sm:$0xff]   ;;  %v3290_v40 = vld [vmem:[#allocation5 + $0x46c] ss:$16 sps:$4 sm:$0xff]  }
  0x96   :  { %1365 = vmatprep.subr.bf16.mxu0 %v3129_v44  ;;  %v3212_v44 = vld [vmem:[#allocation5 + $0x2cc] ss:$16 sps:$4 sm:$0xff]  }
  0x97   :  { %1534 = vmatpush1.bf16.msra.mxu1 %v3125_v43  ;;  %v3209_v43 = vld [vmem:[#allocation5 + $0x2e4] ss:$16 sps:$4 sm:$0xff]  }
  0x98   :  { %1535 = vmatprep.subr.bf16.mxu1 %v3133_v45  ;;  %v3207_v45 = vld [vmem:[#allocation5 + $0x2e0] ss:$16 sps:$4 sm:$0xff]  }
  0x99   :  { %1366 = vmatpush1.bf16.msra.mxu0 %v3134_v47  ;;  %v3215_v47 = vld [vmem:[#allocation5 + $0x304] ss:$16 sps:$4 sm:$0xff]  }
  0x9a   :  { %1367 = vmatprep.subr.bf16.mxu0 %v3135_v48  ;;  %v3218_v48 = vld [vmem:[#allocation5 + $0x2ec] ss:$16 sps:$4 sm:$0xff]  }
  0x9b   :  { %1536 = vmatpush1.bf16.msra.mxu1 %v3131_v46  ;;  %v3210_v46 = vld [vmem:[#allocation5 + $0x2c8] ss:$16 sps:$4 sm:$0xff]  }
  0x9c   :  { %1537 = vmatprep.subr.bf16.mxu1 %v3139_v49  ;;  %v3213_v49 = vld [vmem:[#allocation5 + $0x300] ss:$16 sps:$4 sm:$0xff]  }
  0x9d   :  { %1368 = vmatpush1.bf16.msra.mxu0 %v3140_v53  ;;  %v3219_v53 = vld [vmem:[#allocation5 + $0x320] ss:$16 sps:$4 sm:$0xff]  }
  0x9e   :  { %1369 = vmatprep.subr.bf16.mxu0 %v3141_v55  ;;  %v3227_v55 = vld [vmem:[#allocation5 + $0x344] ss:$16 sps:$4 sm:$0xff]  }
  0x9f   :  { %1538 = vmatpush1.bf16.msra.mxu1 %v3137_v50  ;;  %v3216_v50 = vld [vmem:[#allocation5 + $0x2e8] ss:$16 sps:$4 sm:$0xff]  }
  0xa0   :  { %1539 = vmatprep.subr.bf16.mxu1 %v3145_v56  ;;  %v3230_v56 = vld [vmem:[#allocation5 + $0x32c] ss:$16 sps:$4 sm:$0xff]  }
  0xa1   :  { %1370 = vmatpush1.bf16.msra.mxu0 %v3146_v57  ;;  %v3225_v57 = vld [vmem:[#allocation5 + $0x340] ss:$16 sps:$4 sm:$0xff]  }
  0xa2   :  { %1371 = vmatprep.subr.bf16.mxu0 %v3147_v59  ;;  %v3233_v59 = vld [vmem:[#allocation5 + $0x364] ss:$16 sps:$4 sm:$0xff]  }
  0xa3   :  { %1540 = vmatpush1.bf16.msra.mxu1 %v3143_v58  ;;  %v3228_v58 = vld [vmem:[#allocation5 + $0x328] ss:$16 sps:$4 sm:$0xff]  }
  0xa4   :  { %1541 = vmatprep.subr.bf16.mxu1 %v3151_v60  ;;  %v3236_v60 = vld [vmem:[#allocation5 + $0x34c] ss:$16 sps:$4 sm:$0xff]  }
  0xa5   :  { %1372 = vmatpush1.bf16.msra.mxu0 %v3152_v61  ;;  %v3231_v61 = vld [vmem:[#allocation5 + $0x360] ss:$16 sps:$4 sm:$0xff]  }
  0xa6   :  { %1373 = vmatprep.subr.bf16.mxu0 %v3153_v63  ;;  %v3239_v63 = vld [vmem:[#allocation5 + $0x384] ss:$16 sps:$4 sm:$0xff]  }
  0xa7   :  { %1542 = vmatpush1.bf16.msra.mxu1 %v3149_v62  ;;  %v3234_v62 = vld [vmem:[#allocation5 + $0x348] ss:$16 sps:$4 sm:$0xff]  }
  0xa8   :  { %1543 = vmatprep.subr.bf16.mxu1 %v3157_v1  ;;  %v3242_v1 = vld [vmem:[#allocation5 + $0x36c] ss:$16 sps:$4 sm:$0xff]  }
  0xa9   :  { %1374 = vmatpush1.bf16.msra.mxu0 %v3158_v2  ;;  %v3237_v2 = vld [vmem:[#allocation5 + $0x380] ss:$16 sps:$4 sm:$0xff]  }
  0xaa   :  { %1375 = vmatprep.subr.bf16.mxu0 %v3159_v4  ;;  %v3245_v4 = vld [vmem:[#allocation5 + $0x3a4] ss:$16 sps:$4 sm:$0xff]  }
  0xab   :  { %1544 = vmatpush1.bf16.msra.mxu1 %v3155_v3  ;;  %v3240_v3 = vld [vmem:[#allocation5 + $0x368] ss:$16 sps:$4 sm:$0xff]  }
  0xac   :  { %1545 = vmatprep.subr.bf16.mxu1 %v3163_v5  ;;  %v3248_v5 = vld [vmem:[#allocation5 + $0x38c] ss:$16 sps:$4 sm:$0xff]  }
  0xad   :  { %1376 = vmatpush1.bf16.msra.mxu0 %v3164_v6  ;;  %v3243_v6 = vld [vmem:[#allocation5 + $0x3a0] ss:$16 sps:$4 sm:$0xff]  }
  0xae   :  { %1388 = vmatprep.subr.bf16.mxu0 %v3167_v10  ;;  %v3249_v10 = vld [vmem:[#allocation5 + $0x3c0] ss:$16 sps:$4 sm:$0xff]  }
  0xaf   :  { %1546 = vmatpush1.bf16.msra.mxu1 %v3161_v9  ;;  %v3254_v9 = vld [vmem:[#allocation5 + $0x3ac] ss:$16 sps:$4 sm:$0xff]  }
  0xb0   :  { %1547 = vmatprep.subr.bf16.mxu1 %v3170_v12  ;;  %1378 = vmatmul.mubr.bf16.vlgmr.msra.gmra.mrb[0].mxu0 %v136_v13  ;;  %v3252_v12 = vld [vmem:[#allocation5 + $0x3a8] ss:$16 sps:$4 sm:$0xff]  }
  0xb1   :  { %1389 = vmatpush1.bf16.msra.mxu0 %v3165_v14  ;;  %1420 = vmatprep.mubr.bf16.mxu0 %v139_v42  ;;  %v3260_v14 = vld [vmem:[#allocation5 + $0x3cc] ss:$16 sps:$4 sm:$0xff]  }
  0xb2   :  { %1390 = vmatprep.subr.bf16.mxu0 %v3173_v16  ;;  %v124_v16 = vld [vmem:[#allocation2 + $0x10] sm:$0xff] }
  0xb3   :  { %1548 = vmatpush1.bf16.msra.mxu1 %v3168_v15  ;;  %v3255_v15 = vld [vmem:[#allocation5 + $0x3e0] ss:$16 sps:$4 sm:$0xff]  }
  0xb4   :  { %1560 = vmatprep.subr.bf16.mxu1 %v3176_v17  ;;  %v131_v17 = vld [vmem:[#allocation2 + $0x48] sm:$0xff] }
  0xb5   :  { %1391 = vmatpush1.bf16.msra.mxu0 %v3171_v18  ;;  %v3258_v18 = vld [vmem:[#allocation5 + $0x3c8] ss:$16 sps:$4 sm:$0xff]  }
  0xb6   :  { %1550 = vmatmul.mubr.bf16.vlgmr.msra.gmra.mrb[4].mxu1 %v136_v13  ;;  %1392 = vmatprep.subr.bf16.mxu0 %v3179_v20  ;;  %v3257_v13 = vld [vmem:[#allocation5 + $0x3e4] ss:$16 sps:$4 sm:$0xff]   ;;  %v3266_v20 = vld [vmem:[#allocation5 + $0x3ec] ss:$16 sps:$4 sm:$0xff]  }
  0xb7   :  { %1561 = vmatpush1.bf16.msra.mxu1 %v3174_v19  ;;  %1592 = vmatprep.mubr.bf16.mxu1 %v139_v42  ;;  %v3263_v19 = vld [vmem:[#allocation5 + $0x404] ss:$16 sps:$4 sm:$0xff]   ;;  %v3288_v42 = vld [vmem:[#allocation5 + $0x468] ss:$16 sps:$4 sm:$0xff]  }
  0xb8   :  { %1562 = vmatprep.subr.bf16.mxu1 %v3182_v21  ;;  %v138_v21 = vpack.c.bf16 %v131_v17, %v124_v16  ;;  %v3342_v16 = vld [vmem:[#allocation5 + $0x588] ss:$16 sps:$4 sm:$0xff]   ;;  %v3347_v17 = vld [vmem:[#allocation5 + $0x5c4] ss:$16 sps:$4 sm:$0xff]  }
  0xb9   :  { %1393 = vmatpush1.bf16.msra.mxu0 %v3177_v22  ;;  %v3261_v22 = vld [vmem:[#allocation5 + $0x400] ss:$16 sps:$4 sm:$0xff]  }
  0xba   :  { %1394 = vmatprep.subr.bf16.mxu0 %v3185_v24  ;;  %v3269_v24 = vld [vmem:[#allocation5 + $0x424] ss:$16 sps:$4 sm:$0xff]  }
  0xbb   :  { %1563 = vmatpush1.bf16.msra.mxu1 %v3180_v23  ;;  %v3264_v23 = vld [vmem:[#allocation5 + $0x3e8] ss:$16 sps:$4 sm:$0xff]  }
  0xbc   :  { %1564 = vmatprep.subr.bf16.mxu1 %v3188_v25  ;;  %v3272_v25 = vld [vmem:[#allocation5 + $0x40c] ss:$16 sps:$4 sm:$0xff]  }
  0xbd   :  { %1395 = vmatpush1.bf16.msra.mxu0 %v3183_v26  ;;  %v127_v26 = vld [vmem:[#allocation2 + $0x28] sm:$0xff] }
  0xbe   :  { %1396 = vmatprep.subr.bf16.mxu0 %v3191_v28  ;;  %v3267_v28 = vld [vmem:[#allocation5 + $0x420] ss:$16 sps:$4 sm:$0xff]  }
  0xbf   :  { %1565 = vmatpush1.bf16.msra.mxu1 %v3186_v27  ;;  %v134_v27 = vld [vmem:[#allocation2 + $0x60] sm:$0xff] }
  0xc0   :  { %1566 = vmatprep.subr.bf16.mxu1 %v3194_v29  ;;  %v141_v29 = vpack.c.bf16 %v134_v27, %v127_v26  ;;  %v3354_v26 = vld [vmem:[#allocation5 + $0x5c8] ss:$16 sps:$4 sm:$0xff]   ;;  %v3365_v27 = vld [vmem:[#allocation7 + $0x4] ss:$8 sps:$4 sm:$0xff]  }
  0xc1   :  { %1397 = vmatpush1.bf16.msra.mxu0 %v3189_v30  ;;  %v3270_v30 = vld [vmem:[#allocation5 + $0x408] ss:$16 sps:$4 sm:$0xff]  }
  0xc2   :  { %1398 = vmatprep.subr.bf16.mxu0 %v3197_v32  ;;  %v3278_v32 = vld [vmem:[#allocation5 + $0x42c] ss:$16 sps:$4 sm:$0xff]  }
  0xc3   :  { %1567 = vmatpush1.bf16.msra.mxu1 %v3192_v31  ;;  %v3275_v31 = vld [vmem:[#allocation5 + $0x444] ss:$16 sps:$4 sm:$0xff]  }
  0xc4   :  { %1568 = vmatprep.subr.bf16.mxu1 %v3200_v33  ;;  %v3273_v33 = vld [vmem:[#allocation5 + $0x440] ss:$16 sps:$4 sm:$0xff]  }
  0xc5   :  { %1399 = vmatpush1.bf16.msra.mxu0 %v3195_v34  ;;  %v3276_v34 = vld [vmem:[#allocation5 + $0x428] ss:$16 sps:$4 sm:$0xff]  }
  0xc6   :  { %1400 = vmatprep.subr.bf16.mxu0 %v3203_v36  ;;  %v3284_v36 = vld [vmem:[#allocation5 + $0x44c] ss:$16 sps:$4 sm:$0xff]  }
  0xc7   :  { %1569 = vmatpush1.bf16.msra.mxu1 %v3198_v35  ;;  %v3281_v35 = vld [vmem:[#allocation5 + $0x464] ss:$16 sps:$4 sm:$0xff]  }
  0xc8   :  { %1570 = vmatprep.subr.bf16.mxu1 %v3206_v37  ;;  %v3279_v37 = vld [vmem:[#allocation5 + $0x460] ss:$16 sps:$4 sm:$0xff]  }
  0xc9   :  { %1401 = vmatpush1.bf16.msra.mxu0 %v3201_v38  ;;  %v3282_v38 = vld [vmem:[#allocation5 + $0x448] ss:$16 sps:$4 sm:$0xff]  }
  0xca   :  { %1402 = vmatprep.subr.bf16.mxu0 %v3209_v43  ;;  %v3293_v43 = vld [vmem:[#allocation5 + $0x4a4] ss:$16 sps:$4 sm:$0xff]  }
  0xcb   :  { %1571 = vmatpush1.bf16.msra.mxu1 %v3204_v41  ;;  %v3285_v41 = vld [vmem:[#allocation5 + $0x480] ss:$16 sps:$4 sm:$0xff]  }
  0xcc   :  { %1572 = vmatprep.subr.bf16.mxu1 %v3212_v44  ;;  %v3296_v44 = vld [vmem:[#allocation5 + $0x48c] ss:$16 sps:$4 sm:$0xff]  }
  0xcd   :  { %1403 = vmatpush1.bf16.msra.mxu0 %v3207_v45  ;;  %v3291_v45 = vld [vmem:[#allocation5 + $0x4a0] ss:$16 sps:$4 sm:$0xff]  }
  0xce   :  { %1404 = vmatprep.subr.bf16.mxu0 %v3215_v47  ;;  %v3299_v47 = vld [vmem:[#allocation5 + $0x4c4] ss:$16 sps:$4 sm:$0xff]  }
  0xcf   :  { %1573 = vmatpush1.bf16.msra.mxu1 %v3210_v46  ;;  %v3294_v46 = vld [vmem:[#allocation5 + $0x488] ss:$16 sps:$4 sm:$0xff]  }
  0xd0   :  { %1574 = vmatprep.subr.bf16.mxu1 %v3218_v48  ;;  %v3302_v48 = vld [vmem:[#allocation5 + $0x4ac] ss:$16 sps:$4 sm:$0xff]  }
  0xd1   :  { %1405 = vmatpush1.bf16.msra.mxu0 %v3213_v49  ;;  %v3297_v49 = vld [vmem:[#allocation5 + $0x4c0] ss:$16 sps:$4 sm:$0xff]  }
  0xd2   :  { %1406 = vmatprep.subr.bf16.mxu0 %v3221_v51  ;;  %v3305_v51 = vld [vmem:[#allocation5 + $0x4e4] ss:$16 sps:$4 sm:$0xff]  }
  0xd3   :  { %1575 = vmatpush1.bf16.msra.mxu1 %v3216_v50  ;;  %v3300_v50 = vld [vmem:[#allocation5 + $0x4a8] ss:$16 sps:$4 sm:$0xff]  }
  0xd4   :  { %1576 = vmatprep.subr.bf16.mxu1 %v3224_v52  ;;  %v3308_v52 = vld [vmem:[#allocation5 + $0x4cc] ss:$16 sps:$4 sm:$0xff]  }
  0xd5   :  { %1407 = vmatpush1.bf16.msra.mxu0 %v3219_v53  ;;  %v3303_v53 = vld [vmem:[#allocation5 + $0x4e0] ss:$16 sps:$4 sm:$0xff]  }
  0xd6   :  { %1408 = vmatprep.subr.bf16.mxu0 %v3227_v55  ;;  %v3311_v55 = vld [vmem:[#allocation5 + $0x504] ss:$16 sps:$4 sm:$0xff]  }
  0xd7   :  { %1577 = vmatpush1.bf16.msra.mxu1 %v3222_v54  ;;  %v3306_v54 = vld [vmem:[#allocation5 + $0x4c8] ss:$16 sps:$4 sm:$0xff]  }
  0xd8   :  { %1578 = vmatprep.subr.bf16.mxu1 %v3230_v56  ;;  %v3314_v56 = vld [vmem:[#allocation5 + $0x4ec] ss:$16 sps:$4 sm:$0xff]  }
  0xd9   :  { %1409 = vmatpush1.bf16.msra.mxu0 %v3225_v57  ;;  %v3309_v57 = vld [vmem:[#allocation5 + $0x500] ss:$16 sps:$4 sm:$0xff]  }
  0xda   :  { %1410 = vmatprep.subr.bf16.mxu0 %v3233_v59  ;;  %v3317_v59 = vld [vmem:[#allocation5 + $0x524] ss:$16 sps:$4 sm:$0xff]  }
  0xdb   :  { %1579 = vmatpush1.bf16.msra.mxu1 %v3228_v58  ;;  %v3312_v58 = vld [vmem:[#allocation5 + $0x4e8] ss:$16 sps:$4 sm:$0xff]  }
  0xdc   :  { %1580 = vmatprep.subr.bf16.mxu1 %v3236_v60  ;;  %v3320_v60 = vld [vmem:[#allocation5 + $0x50c] ss:$16 sps:$4 sm:$0xff]  }
  0xdd   :  { %1411 = vmatpush1.bf16.msra.mxu0 %v3231_v61  ;;  %v3315_v61 = vld [vmem:[#allocation5 + $0x520] ss:$16 sps:$4 sm:$0xff]  }
  0xde   :  { %1412 = vmatprep.subr.bf16.mxu0 %v3239_v63  ;;  %v3323_v63 = vld [vmem:[#allocation5 + $0x544] ss:$16 sps:$4 sm:$0xff]  }
  0xdf   :  { %1581 = vmatpush1.bf16.msra.mxu1 %v3234_v62  ;;  %v3318_v62 = vld [vmem:[#allocation5 + $0x508] ss:$16 sps:$4 sm:$0xff]  }
  0xe0   :  { %1582 = vmatprep.subr.bf16.mxu1 %v3242_v1  ;;  %v3326_v1 = vld [vmem:[#allocation5 + $0x52c] ss:$16 sps:$4 sm:$0xff]  }
  0xe1   :  { %1413 = vmatpush1.bf16.msra.mxu0 %v3237_v2  ;;  %v3321_v2 = vld [vmem:[#allocation5 + $0x540] ss:$16 sps:$4 sm:$0xff]  }
  0xe2   :  { %1414 = vmatprep.subr.bf16.mxu0 %v3245_v4  ;;  %v3329_v4 = vld [vmem:[#allocation5 + $0x564] ss:$16 sps:$4 sm:$0xff]  }
  0xe3   :  { %1583 = vmatpush1.bf16.msra.mxu1 %v3240_v3  ;;  %v3324_v3 = vld [vmem:[#allocation5 + $0x528] ss:$16 sps:$4 sm:$0xff]  }
  0xe4   :  { %1584 = vmatprep.subr.bf16.mxu1 %v3248_v5  ;;  %v3332_v5 = vld [vmem:[#allocation5 + $0x54c] ss:$16 sps:$4 sm:$0xff]  }
  0xe5   :  { %1415 = vmatpush1.bf16.msra.mxu0 %v3243_v6  ;;  %v3327_v6 = vld [vmem:[#allocation5 + $0x560] ss:$16 sps:$4 sm:$0xff]  }
  0xe6   :  { %1416 = vmatprep.subr.bf16.mxu0 %v3251_v8  ;;  %v3335_v8 = vld [vmem:[#allocation5 + $0x584] ss:$16 sps:$4 sm:$0xff]  }
  0xe7   :  { %1585 = vmatpush1.bf16.msra.mxu1 %v3246_v7  ;;  %v3330_v7 = vld [vmem:[#allocation5 + $0x548] ss:$16 sps:$4 sm:$0xff]  }
  0xe8   :  { %1586 = vmatprep.subr.bf16.mxu1 %v3254_v9  ;;  %v3338_v9 = vld [vmem:[#allocation5 + $0x56c] ss:$16 sps:$4 sm:$0xff]  }
  0xe9   :  { %1417 = vmatpush1.bf16.msra.mxu0 %v3249_v10  ;;  %v3333_v10 = vld [vmem:[#allocation5 + $0x580] ss:$16 sps:$4 sm:$0xff]  }
  0xea   :  { %1418 = vmatprep.subr.bf16.mxu0 %v3257_v13  ;;  %v3341_v13 = vld [vmem:[#allocation5 + $0x5a4] ss:$16 sps:$4 sm:$0xff]  }
  0xeb   :  { %1587 = vmatpush1.bf16.msra.mxu1 %v3252_v12  ;;  %v3336_v12 = vld [vmem:[#allocation5 + $0x568] ss:$16 sps:$4 sm:$0xff]  }
  0xec   :  { %1588 = vmatprep.subr.bf16.mxu1 %v3260_v14  ;;  %v3344_v14 = vld [vmem:[#allocation5 + $0x58c] ss:$16 sps:$4 sm:$0xff]  }
  0xed   :  { %1419 = vmatpush1.bf16.msra.mxu0 %v3255_v15  ;;  %v3339_v15 = vld [vmem:[#allocation5 + $0x5a0] ss:$16 sps:$4 sm:$0xff]  }
  0xee   :  { %1431 = vmatprep.subr.bf16.mxu0 %v3263_v19  ;;  %v3345_v19 = vld [vmem:[#allocation5 + $0x5c0] ss:$16 sps:$4 sm:$0xff]  }
  0xef   :  { %1589 = vmatpush1.bf16.msra.mxu1 %v3258_v18  ;;  %v3350_v18 = vld [vmem:[#allocation5 + $0x5ac] ss:$16 sps:$4 sm:$0xff]  }
  0xf0   :  { %1590 = vmatprep.subr.bf16.mxu1 %v3266_v20  ;;  %1421 = vmatmul.mubr.bf16.vlgmr.msra.gmra.mrb[0].mxu0 %v138_v21  ;;  %v3348_v20 = vld [vmem:[#allocation5 + $0x5a8] ss:$16 sps:$4 sm:$0xff]  }
  0xf1   :  { %1432 = vmatpush1.bf16.msra.mxu0 %v3261_v22  ;;  %1463 = vmatprep.mubr.bf16.mxu0 %v141_v29  ;;  %v3356_v22 = vld [vmem:[#allocation5 + $0x5cc] ss:$16 sps:$4 sm:$0xff]  }
  0xf2   :  { %1433 = vmatprep.subr.bf16.mxu0 %v3269_v24  ;;  %v126_v24 = vld [vmem:[#allocation2 + $0x20] sm:$0xff] }
  0xf3   :  { %1591 = vmatpush1.bf16.msra.mxu1 %v3264_v23  ;;  %v3351_v23 = vld [vmem:[#allocation5 + $0x5e0] ss:$16 sps:$4 sm:$0xff]  }
  0xf4   :  { %1603 = vmatprep.subr.bf16.mxu1 %v3272_v25  ;;  %v133_v25 = vld [vmem:[#allocation2 + $0x58] sm:$0xff] }
  0xf5   :  { %1434 = vmatpush1.bf16.msra.mxu0 %v3267_v28  ;;  %v3359_v28 = vld [vmem:[#allocation5 + $0x5ec] ss:$16 sps:$4 sm:$0xff]  }
  0xf6   :  { %1593 = vmatmul.mubr.bf16.vlgmr.msra.gmra.mrb[4].mxu1 %v138_v21  ;;  %1435 = vmatprep.subr.bf16.mxu0 %v3275_v31  ;;  %v3353_v21 = vld [vmem:[#allocation5 + $0x5e4] ss:$16 sps:$4 sm:$0xff]   ;;  %v3357_v31 = vld [vmem:[#allocation5 + $0x5e8] ss:$16 sps:$4 sm:$0xff]  }
  0xf7   :  { %1604 = vmatpush1.bf16.msra.mxu1 %v3270_v30  ;;  %1635 = vmatprep.mubr.bf16.mxu1 %v141_v29  ;;  %v140_v29 = vpack.c.bf16 %v133_v25, %v126_v24  ;;  %v3363_v30 = vld [vmem:[#allocation7] ss:$8 sps:$4 sm:$0xff]  }
  0xf8   :  { %1605 = vmatprep.subr.bf16.mxu1 %v3278_v32  ;;  %v3368_v32 = vld [vmem:[#allocation7 + $0x14] ss:$8 sps:$4 sm:$0xff]  }
  0xf9   :  { %1436 = vmatpush1.bf16.msra.mxu0 %v3273_v33  ;;  %v3362_v33 = vld [vmem:[#allocation5 + $0x60c] ss:$16 sps:$4 sm:$0xff]  }
  0xfa   :  { %1437 = vmatprep.subr.bf16.mxu0 %v3281_v35  ;;  %v3360_v35 = vld [vmem:[#allocation5 + $0x608] ss:$16 sps:$4 sm:$0xff]  }
  0xfb   :  { %1606 = vmatpush1.bf16.msra.mxu1 %v3276_v34  ;;  %v3366_v34 = vld [vmem:[#allocation7 + $0x10] ss:$8 sps:$4 sm:$0xff]  }
  0xfc   :  { %1607 = vmatprep.subr.bf16.mxu1 %v3284_v36  ;;  %v3371_v36 = vld [vmem:[#allocation7 + $0x24] ss:$8 sps:$4 sm:$0xff]  }
  0xfd   :  { %1438 = vmatpush1.bf16.msra.mxu0 %v3279_v37  ;;  %v3369_v37 = vld [vmem:[#allocation7 + $0x20] ss:$8 sps:$4 sm:$0xff]  }
  0xfe   :  { %1439 = vmatprep.subr.bf16.mxu0 %v3287_v39  ;;  %v3372_v39 = vld [vmem:[#allocation7 + $0x30] ss:$8 sps:$4 sm:$0xff]  }
  0xff   :  { %1608 = vmatpush1.bf16.msra.mxu1 %v3282_v38  ;;  %v3374_v38 = vld [vmem:[#allocation7 + $0x34] ss:$8 sps:$4 sm:$0xff]  }
 0x100   :  { %1609 = vmatprep.subr.bf16.mxu1 %v3290_v40  ;;  %v3377_v40 = vld [vmem:[#allocation7 + $0x44] ss:$8 sps:$4 sm:$0xff]  }
 0x101   :  { %1440 = vmatpush1.bf16.msra.mxu0 %v3285_v41  ;;  %v3375_v41 = vld [vmem:[#allocation7 + $0x40] ss:$8 sps:$4 sm:$0xff]  }
 0x102   :  { %1441 = vmatprep.subr.bf16.mxu0 %v3293_v43  ;;  %v3378_v43 = vld [vmem:[#allocation7 + $0x50] ss:$8 sps:$4 sm:$0xff]  }
 0x103   :  { %1610 = vmatpush1.bf16.msra.mxu1 %v3288_v42  ;;  %v3380_v42 = vld [vmem:[#allocation7 + $0x54] ss:$8 sps:$4 sm:$0xff]  }
 0x104   :  { %1611 = vmatprep.subr.bf16.mxu1 %v3296_v44  ;;  %v3383_v44 = vld [vmem:[#allocation7 + $0x64] ss:$8 sps:$4 sm:$0xff]  }
 0x105   :  { %1442 = vmatpush1.bf16.msra.mxu0 %v3291_v45  ;;  %v3381_v45 = vld [vmem:[#allocation7 + $0x60] ss:$8 sps:$4 sm:$0xff]  }
 0x106   :  { %1443 = vmatprep.subr.bf16.mxu0 %v3299_v47 }
 0x107   :  { %1612 = vmatpush1.bf16.msra.mxu1 %v3294_v46 }
 0x108   :  { %1613 = vmatprep.subr.bf16.mxu1 %v3302_v48  ;;  %v3384_v48 = vld [vmem:[#allocation7 + $0x70] ss:$8 sps:$4 sm:$0xff]  }
 0x109   :  { %1444 = vmatpush1.bf16.msra.mxu0 %v3297_v49 }
 0x10a   :  { %1445 = vmatprep.subr.bf16.mxu0 %v3305_v51 }
 0x10b   :  { %1614 = vmatpush1.bf16.msra.mxu1 %v3300_v50  ;;  %v3389_v50 = vld [vmem:[#allocation7 + $0x84] ss:$8 sps:$4 sm:$0xff]  }
 0x10c   :  { %1615 = vmatprep.subr.bf16.mxu1 %v3308_v52  ;;  %v3392_v52 = vld [vmem:[#allocation7 + $0x94] ss:$8 sps:$4 sm:$0xff]  }
 0x10d   :  { %1446 = vmatpush1.bf16.msra.mxu0 %v3303_v53  ;;  %v3390_v53 = vld [vmem:[#allocation7 + $0x90] ss:$8 sps:$4 sm:$0xff]  }
 0x10e   :  { %1447 = vmatprep.subr.bf16.mxu0 %v3311_v55  ;;  %v3393_v55 = vld [vmem:[#allocation7 + $0xa0] ss:$8 sps:$4 sm:$0xff]  }
 0x10f   :  { %1616 = vmatpush1.bf16.msra.mxu1 %v3306_v54  ;;  %v3395_v54 = vld [vmem:[#allocation7 + $0xa4] ss:$8 sps:$4 sm:$0xff]  }
 0x110   :  { %1617 = vmatprep.subr.bf16.mxu1 %v3314_v56  ;;  %v3398_v56 = vld [vmem:[#allocation7 + $0xb4] ss:$8 sps:$4 sm:$0xff]  }
 0x111   :  { %1448 = vmatpush1.bf16.msra.mxu0 %v3309_v57  ;;  %v3396_v57 = vld [vmem:[#allocation7 + $0xb0] ss:$8 sps:$4 sm:$0xff]  }
 0x112   :  { %1449 = vmatprep.subr.bf16.mxu0 %v3317_v59  ;;  %v3399_v59 = vld [vmem:[#allocation7 + $0xc0] ss:$8 sps:$4 sm:$0xff]  }
 0x113   :  { %1618 = vmatpush1.bf16.msra.mxu1 %v3312_v58  ;;  %v3401_v58 = vld [vmem:[#allocation7 + $0xc4] ss:$8 sps:$4 sm:$0xff]  }
 0x114   :  { %1619 = vmatprep.subr.bf16.mxu1 %v3320_v60  ;;  %v3404_v60 = vld [vmem:[#allocation7 + $0xd4] ss:$8 sps:$4 sm:$0xff]  }
 0x115   :  { %1450 = vmatpush1.bf16.msra.mxu0 %v3315_v61  ;;  %v3402_v61 = vld [vmem:[#allocation7 + $0xd0] ss:$8 sps:$4 sm:$0xff]  }
 0x116   :  { %1451 = vmatprep.subr.bf16.mxu0 %v3323_v63  ;;  %v3405_v63 = vld [vmem:[#allocation7 + $0xe0] ss:$8 sps:$4 sm:$0xff]  }
 0x117   :  { %1620 = vmatpush1.bf16.msra.mxu1 %v3318_v62  ;;  %v3407_v62 = vld [vmem:[#allocation7 + $0xe4] ss:$8 sps:$4 sm:$0xff]  }
 0x118   :  { %1621 = vmatprep.subr.bf16.mxu1 %v3326_v1  ;;  %v3410_v1 = vld [vmem:[#allocation7 + $0xf4] ss:$8 sps:$4 sm:$0xff]  }
 0x119   :  { %1452 = vmatpush1.bf16.msra.mxu0 %v3321_v2  ;;  %v3408_v2 = vld [vmem:[#allocation7 + $0xf0] ss:$8 sps:$4 sm:$0xff]  }
 0x11a   :  { %1453 = vmatprep.subr.bf16.mxu0 %v3329_v4  ;;  %v3459_v4 = vld [vmem:[#allocation8 + $0x40] sm:$0xff]  }
 0x11b   :  { %1622 = vmatpush1.bf16.msra.mxu1 %v3324_v3  ;;  %v3413_v3 = vld [vmem:[#allocation7 + $0x104] ss:$8 sps:$4 sm:$0xff]  }
 0x11c   :  { %1623 = vmatprep.subr.bf16.mxu1 %v3332_v5  ;;  %v3460_v5 = vld [vmem:[#allocation8] sm:$0xff]  }
 0x11d   :  { %1454 = vmatpush1.bf16.msra.mxu0 %v3327_v6  ;;  %v3461_v6 = vld [vmem:[#allocation8 + $0x48] sm:$0xff]  }
 0x11e   :  { %1455 = vmatprep.subr.bf16.mxu0 %v3335_v8  ;;  %v3463_v8 = vld [vmem:[#allocation8 + $0x50] sm:$0xff]  }
 0x11f   :  { %1624 = vmatpush1.bf16.msra.mxu1 %v3330_v7  ;;  %v3462_v7 = vld [vmem:[#allocation8 + $0x8] sm:$0xff]  }
 0x120   :  { %1625 = vmatprep.subr.bf16.mxu1 %v3338_v9  ;;  %v3464_v9 = vld [vmem:[#allocation8 + $0x10] sm:$0xff]  }
 0x121   :  { %1456 = vmatpush1.bf16.msra.mxu0 %v3333_v10  ;;  %v3465_v10 = vld [vmem:[#allocation8 + $0x58] sm:$0xff]  }
 0x122   :  { %1457 = vmatprep.subr.bf16.mxu0 %v3341_v13  ;;  %v3467_v13 = vld [vmem:[#allocation8 + $0x60] sm:$0xff]  }
 0x123   :  { %1626 = vmatpush1.bf16.msra.mxu1 %v3336_v12  ;;  %v3466_v12 = vld [vmem:[#allocation8 + $0x18] sm:$0xff]  }
 0x124   :  { %1627 = vmatprep.subr.bf16.mxu1 %v3344_v14  ;;  %v3468_v14 = vld [vmem:[#allocation8 + $0x20] sm:$0xff]  }
 0x125   :  { %1458 = vmatpush1.bf16.msra.mxu0 %v3339_v15  ;;  %v3469_v15 = vld [vmem:[#allocation8 + $0x68] sm:$0xff]  }
 0x126   :  { %1459 = vmatprep.subr.bf16.mxu0 %v3347_v17 }
 0x127   :  { %1628 = vmatpush1.bf16.msra.mxu1 %v3342_v16  ;;  %v341_v16 = vlaneseq }
 0x128   :  { %1629 = vmatprep.subr.bf16.mxu1 %v3350_v18 }
 0x129   :  { %1460 = vmatpush1.bf16.msra.mxu0 %v3345_v19  ;;  %v3837_v17 = vshrl.u32 %v341_v16, 7  ;;  %v339_v19 = vld [vmem:[%s3907_s2] sm:$0xf]  ;;  %v3446_v16 = vld [vmem:[#allocation7 + $0x1b4] ss:$8 sps:$4 sm:$0xff]  }
 0x12a   :  { %1461 = vmatprep.subr.bf16.mxu0 %v3353_v21 }
 0x12b   :  { %1630 = vmatpush1.bf16.msra.mxu1 %v3348_v20  ;;  %v343_v18 = vsub.s32 0, %v3837_v17  ;;  %v347_v20 = vsub.s32 1, %v3837_v17 }
 0x12c   :  { %1631 = vmatprep.subr.bf16.mxu1 %v3356_v22 }
 0x12d   :  { %1462 = vmatpush1.bf16.msra.mxu0 %v3351_v23  ;;  %v344_v21 = vrot.slane %v339_v19, %v343_v18  ;;  %v348_v22 = vrot.slane %v339_v19, %v347_v20 }
 0x12e   :  { %2097 = vmatprep.subr.bf16.mxu0 %v3365_v27 }
 0x12f   :  { %1632 = vmatpush1.bf16.msra.mxu1 %v3354_v26 }
 0x130   :  { %1633 = vmatprep.subr.bf16.mxu1 %v3359_v28  ;;  %1464 = vmatmul.mubr.bf16.vlgmr.msra.gmra.mrb[0].mxu0 %v140_v29 }
 0x131   :  { %2098 = vmatpush1.bf16.msra.mxu0 %v3363_v30 }
 0x132   :  { %2099 = vmatprep.subr.bf16.mxu0 %v3368_v32 }
 0x133   :  { %1634 = vmatpush1.bf16.msra.mxu1 %v3357_v31 }
 0x134   :  { %1646 = vmatprep.subr.bf16.mxu1 %v3362_v33 }
 0x135   :  { %2100 = vmatpush1.bf16.msra.mxu0 %v3366_v34 }
 0x136   :  { %1636 = vmatmul.mubr.bf16.vlgmr.msra.gmra.mrb[4].mxu1 %v140_v29  ;;  %2101 = vmatprep.subr.bf16.mxu0 %v3371_v36 }
 0x137   :  { %1647 = vmatpush1.bf16.msra.mxu1 %v3360_v35  ;;  %1678 = vmatprep.mubr.bf16.mxu1 %v3669_v0  ;;  %v3386_v0 = vld [vmem:[#allocation7 + $0x74] ss:$8 sps:$4 sm:$0xff]  }
 0x138   :  { %2931 = vmatprep.subr.bf16.mxu1 %v3459_v4  ;;  %v3426_v4 = vld [vmem:[#allocation7 + $0x150] ss:$8 sps:$4 sm:$0xff]  }
 0x139   :  { %2102 = vmatpush1.bf16.msra.mxu0 %v3369_v37 }
 0x13a   :  { %2103 = vmatprep.subr.bf16.mxu0 %v3374_v38 }
 0x13d   :  { %2104 = vmatpush1.bf16.msra.mxu0 %v3372_v39 }
 0x13e   :  { %2105 = vmatprep.subr.bf16.mxu0 %v3377_v40 }
 0x141   :  { %2106 = vmatpush1.bf16.msra.mxu0 %v3375_v41  ;;  %v3411_v41 = vld [vmem:[#allocation7 + $0x100] ss:$8 sps:$4 sm:$0xff]  }
 0x142   :  { %2822 = vmatmul.mubr.msk.bf16.vlgmr.msra.gmra.mrb[4].mxu1 %vm1341_vm0, %v3822_v11  ;;  %2107 = vmatprep.subr.bf16.mxu0 %v3380_v42  ;;  %v3387_v11 = vld [vmem:[#allocation7 + $0x80] ss:$8 sps:$4 sm:$0xff]   ;;  %v351_v42 = vsub.s32 2, %v3837_v17 }
 0x143   :  { %2932 = vmatpush3.bf16.msra.mxu1 %v3460_v5  ;;  %v3431_v5 = vld [vmem:[#allocation7 + $0x164] ss:$8 sps:$4 sm:$0xff]  }
 0x144   :  { %2933 = vmatprep.subr.bf16.mxu1 %v3461_v6  ;;  %v3429_v6 = vld [vmem:[#allocation7 + $0x160] ss:$8 sps:$4 sm:$0xff]  }
 0x145   :  { %2108 = vmatpush1.bf16.msra.mxu0 %v3378_v43  ;;  %v3416_v43 = vld [vmem:[#allocation7 + $0x114] ss:$8 sps:$4 sm:$0xff]  }
 0x146   :  { %2109 = vmatprep.subr.bf16.mxu0 %v3383_v44  ;;  %v355_v44 = vsub.s32 3, %v3837_v17  ;;  %v3476_v17 = vld [vmem:[#allocation10 + $0x8] sm:$0xff]  }
 0x147   :  { %2934 = vmatpush3.bf16.msra.mxu1 %v3462_v7  ;;  %v3434_v7 = vld [vmem:[#allocation7 + $0x174] ss:$8 sps:$4 sm:$0xff]  }
 0x148   :  { %2935 = vmatprep.subr.bf16.mxu1 %v3463_v8  ;;  %v3432_v8 = vld [vmem:[#allocation7 + $0x170] ss:$8 sps:$4 sm:$0xff]  }
 0x149   :  { %v3829_v46 = vpop.f32.mrb[0].mxu1  ;;  %2110 = vmatpush1.bf16.msra.mxu0 %v3381_v45  ;;  %v352_v45 = vrot.slane %v339_v19, %v351_v42 }
 0x14a   :  { %v3831_v47 = vpop.f32.mrb[1].mxu1  ;;  %2111 = vmatprep.subr.bf16.mxu0 %v3386_v0  ;;  %v3414_v0 = vld [vmem:[#allocation7 + $0x110] ss:$8 sps:$4 sm:$0xff]  }
 0x14b   :  { %v3833_v49 = vpop.f32.mrb[2].mxu1  ;;  %2936 = vmatpush3.bf16.msra.mxu1 %v3464_v9  ;;  %v3437_v9 = vld [vmem:[#allocation7 + $0x184] ss:$8 sps:$4 sm:$0xff]  }
 0x14c   :  { %v3835_v51 = vpop.f32.mrb[3].mxu1  ;;  %2937 = vmatprep.subr.bf16.mxu1 %v3465_v10  ;;  %v3435_v10 = vld [vmem:[#allocation7 + $0x180] ss:$8 sps:$4 sm:$0xff]  }
 0x14d   :  { %2112 = vmatpush1.bf16.msra.mxu0 %v3384_v48 }
 0x14e   :  { %2113 = vmatprep.subr.bf16.mxu0 %v3389_v50 }
 0x14f   :  { %2938 = vmatpush3.bf16.msra.mxu1 %v3466_v12  ;;  %v3440_v12 = vld [vmem:[#allocation7 + $0x194] ss:$8 sps:$4 sm:$0xff]  }
 0x150   :  { %2939 = vmatprep.subr.bf16.mxu1 %v3467_v13  ;;  %v3438_v13 = vld [vmem:[#allocation7 + $0x190] ss:$8 sps:$4 sm:$0xff]  }
 0x151   :  { %2114 = vmatpush1.bf16.msra.mxu0 %v3387_v11 }
 0x152   :  { %2115 = vmatprep.subr.bf16.mxu0 %v3392_v52 }
 0x153   :  { %2940 = vmatpush3.bf16.msra.mxu1 %v3468_v14  ;;  %v3443_v14 = vld [vmem:[#allocation7 + $0x1a4] ss:$8 sps:$4 sm:$0xff]  }
 0x154   :  { %2941 = vmatprep.subr.bf16.mxu1 %v3469_v15  ;;  %v3441_v15 = vld [vmem:[#allocation7 + $0x1a0] ss:$8 sps:$4 sm:$0xff]  }
 0x155   :  { %2116 = vmatpush1.bf16.msra.mxu0 %v3390_v53  ;;  %v3422_v53 = vld [vmem:[#allocation7 + $0x134] ss:$8 sps:$4 sm:$0xff]  }
 0x156   :  { %2117 = vmatprep.subr.bf16.mxu0 %v3395_v54 }
 0x159   :  { %2118 = vmatpush1.bf16.msra.mxu0 %v3393_v55 }
 0x15a   :  { %2119 = vmatprep.subr.bf16.mxu0 %v3398_v56 }
 0x15d   :  { %2120 = vmatpush1.bf16.msra.mxu0 %v3396_v57 }
 0x15e   :  { %2121 = vmatprep.subr.bf16.mxu0 %v3401_v58 }
 0x161   :  { %2122 = vmatpush1.bf16.msra.mxu0 %v3399_v59  ;;  %v3420_v59 = vld [vmem:[#allocation7 + $0x130] ss:$8 sps:$4 sm:$0xff]  }
 0x162   :  { %2123 = vmatprep.subr.bf16.mxu0 %v3404_v60 }
 0x165   :  { %2124 = vmatpush1.bf16.msra.mxu0 %v3402_v61 }
 0x166   :  { %2125 = vmatprep.subr.bf16.mxu0 %v3407_v62  ;;  %v3425_v62 = vld [vmem:[#allocation7 + $0x144] ss:$8 sps:$4 sm:$0xff]  }
 0x169   :  { %2126 = vmatpush1.bf16.msra.mxu0 %v3405_v63 }
 0x16a   :  { %2127 = vmatprep.subr.bf16.mxu0 %v3410_v1 }
 0x16d   :  { %2128 = vmatpush1.bf16.msra.mxu0 %v3408_v2  ;;  %v3423_v2 = vld [vmem:[#allocation7 + $0x140] ss:$8 sps:$4 sm:$0xff]  }
 0x16e   :  { %2140 = vmatprep.subr.bf16.mxu0 %v3413_v3  ;;  %v3428_v3 = vld [vmem:[#allocation7 + $0x154] ss:$8 sps:$4 sm:$0xff]  }
 0x203   :  { %v1465_v23 = vpop.f32.mrb[0].mxu0 }
 0x204   :  { %v3011_v24 = vadd.f32 %v1465_v23, %v344_v21  ;;  %v1467_v25 = vpop.f32.mrb[1].mxu0  ;;  %v3452_v23 = vld [vmem:[#allocation7 + $0x1d4] ss:$8 sps:$4 sm:$0xff]  }
 0x205   :  { %v3013_v26 = vadd.f32 %v1467_v25, %v348_v22  ;;  %v1469_v27 = vpop.f32.mrb[2].mxu0  ;;  %v3455_v25 = vld [vmem:[#allocation7 + $0x1e4] ss:$8 sps:$4 sm:$0xff]  }
 0x206   :  { %v3012_v28 = vadd.f32 %v3011_v24, %v3829_v46  ;;  %v3015_v29 = vadd.f32 %v1469_v27, %v344_v21  ;;  %v1471_v30 = vpop.f32.mrb[3].mxu0  ;;  %v356_v46 = vrot.slane %v339_v19, %v355_v44  ;;  %v3444_v19 = vld [vmem:[#allocation7 + $0x1b0] ss:$8 sps:$4 sm:$0xff]   ;;  %v3449_v21 = vld [vmem:[#allocation7 + $0x1c4] ss:$8 sps:$4 sm:$0xff]  }
 0x207   :  { %v3014_v31 = vadd.f32 %v3013_v26, %v3831_v47  ;;  %v3017_v32 = vadd.f32 %v1471_v30, %v348_v22  ;;  %v3419_v47 = vld [vmem:[#allocation7 + $0x124] ss:$8 sps:$4 sm:$0xff]   ;;  %v3447_v22 = vld [vmem:[#allocation7 + $0x1c0] ss:$8 sps:$4 sm:$0xff]   ;;  %v3450_v24 = vld [vmem:[#allocation7 + $0x1d0] ss:$8 sps:$4 sm:$0xff]  }
 0x208   :  { %v3016_v33 = vadd.f32 %v3015_v29, %v3833_v49  ;;  %v1689_v35 = vmax.f32 %v3012_v28, 0.0  ;;  %v3453_v26 = vld [vmem:[#allocation7 + $0x1e0] ss:$8 sps:$4 sm:$0xff]   ;;  %v3458_v27 = vld [vmem:[#allocation7 + $0x1f4] ss:$8 sps:$4 sm:$0xff]  }
 0x209   :  { %v3018_v34 = vadd.f32 %v3017_v32, %v3835_v51  ;;  %v1690_v37 = vmax.f32 %v3014_v31, 0.0  ;;  %v3417_v51 = vld [vmem:[#allocation7 + $0x120] ss:$8 sps:$4 sm:$0xff]   ;;  %v3456_v28 = vld [vmem:[#allocation7 + $0x1f0] ss:$8 sps:$4 sm:$0xff]  }
 0x20a   :  { %v1693_v36 = vmax.f32 %v3016_v33, 0.0  ;;  %v3470_v29 = vld [vmem:[#allocation8 + $0x28] sm:$0xff]   ;;  %v3471_v30 = vld [vmem:[#allocation8 + $0x70] sm:$0xff]   ;;  %v3473_v32 = vld [vmem:[#allocation8 + $0x78] sm:$0xff]  }
 0x20b   :  { %v1694_v38 = vmax.f32 %v3018_v34, 0.0  ;;  %2942 = vmatpush3.bf16.msra.mxu1 %v3470_v29  ;;  %v3472_v31 = vld [vmem:[#allocation8 + $0x30] sm:$0xff]   ;;  %v3474_v33 = vld [vmem:[#allocation8 + $0x38] sm:$0xff]   ;;  %v3670_v34 = vmov 0.0  }
 0x20c   :  { %v1697_v39 = vpack.c.bf16 %v1693_v36, %v1689_v35  ;;  %2943 = vmatprep.subr.bf16.mxu1 %v3471_v30  ;;  %v1765_v35 = vld [vmem:[%s3909_s4] sm:$0x3] }
 0x20d   :  { %v1698_v40 = vpack.c.bf16 %v1694_v38, %v1690_v37  ;;  %v1770_v36 = vrot.slane %v1765_v35, %v343_v18  ;;  %v1774_v37 = vrot.slane %v1765_v35, %v347_v20  ;;  %v3477_v18 = vld [vmem:[#allocation10 + $0x10] sm:$0xff]   ;;  %v3478_v20 = vld [vmem:[#allocation10 + $0x18] sm:$0xff]  }
 0x20f   :  { %2129 = vmatprep.mubr.bf16.mxu0 %v1698_v40  ;;  %2944 = vmatpush3.bf16.msra.mxu1 %v3472_v31 }
 0x210   :  { %2130 = vmatmul.mubr.bf16.vlgmr.msra.gmra.mrb[4].mxu0 %v1697_v39  ;;  %2945 = vmatprep.subr.bf16.mxu1 %v3473_v32 }
 0x211   :  { %2141 = vmatpush1.bf16.msra.mxu0 %v3411_v41 }
 0x212   :  { %2142 = vmatprep.subr.bf16.mxu0 %v3416_v43 }
 0x213   :  { %2946 = vmatpush3.bf16.msra.mxu1 %v3474_v33 }
 0x214   :  { %2971 = vmatprep.subr.bf16.mxu1 %v3670_v34 }
 0x215   :  { %v1680_v48 = vpop.f32.mrb[4].mxu1  ;;  %2143 = vmatpush1.bf16.msra.mxu0 %v3414_v0 }
 0x216   :  { %v3019_v49 = vadd.f32 %v1680_v48, %v352_v45  ;;  %v1682_v50 = vpop.f32.mrb[5].mxu1  ;;  %2144 = vmatprep.subr.bf16.mxu0 %v3419_v47 }
 0x217   :  { %v3020_v11 = vadd.f32 %v1682_v50, %v356_v46  ;;  %v1684_v52 = vpop.f32.mrb[6].mxu1 }
 0x218   :  { %v3021_v54 = vadd.f32 %v1684_v52, %v352_v45  ;;  %v1686_v55 = vpop.f32.mrb[7].mxu1  ;;  %v1691_v57 = vmax.f32 %v3019_v49, 0.0  ;;  %v3480_v52 = vld [vmem:[#allocation10 + $0x28] sm:$0xff]  }
 0x219   :  { %v3022_v56 = vadd.f32 %v1686_v55, %v356_v46  ;;  %2145 = vmatpush1.bf16.msra.mxu0 %v3417_v51  ;;  %v1692_v60 = vmax.f32 %v3020_v11, 0.0  ;;  %v3475_v51 = vld [vmem:[#allocation10] sm:$0xff]  }
 0x21a   :  { %v1695_v58 = vmax.f32 %v3021_v54, 0.0  ;;  %2146 = vmatprep.subr.bf16.mxu0 %v3422_v53  ;;  %v3479_v11 = vld [vmem:[#allocation10 + $0x20] sm:$0xff]   ;;  %v3481_v53 = vld [vmem:[#allocation10 + $0x30] sm:$0xff]   ;;  %v3482_v54 = vld [vmem:[#allocation10 + $0x38] sm:$0xff]  }
 0x21b   :  { %v1696_v61 = vmax.f32 %v3022_v56, 0.0  ;;  %v2887_v56 = vld [vmem:[%s3911_s6] ss:$0 sm:$0xff] }
 0x21c   :  { %v1699_v63 = vpack.c.bf16 %v1695_v58, %v1691_v57 }
 0x21d   :  { %v1700_v1 = vpack.c.bf16 %v1696_v61, %v1692_v60  ;;  %2147 = vmatpush1.bf16.msra.mxu0 %v3420_v59 }
 0x21e   :  { %2148 = vmatprep.subr.bf16.mxu0 %v3425_v62 }
 0x21f   :  { %2172 = vmatprep.mubr.bf16.mxu0 %v1700_v1 }
 0x221   :  { %2149 = vmatpush1.bf16.msra.mxu0 %v3423_v2 }
 0x222   :  { %2150 = vmatprep.subr.bf16.mxu0 %v3428_v3  ;;  %v3483_v3 = vld [vmem:[#allocation11] sm:$0xff]  }
 0x225   :  { %2151 = vmatpush1.bf16.msra.mxu0 %v3426_v4 }
 0x226   :  { %2152 = vmatprep.subr.bf16.mxu0 %v3431_v5  ;;  %v3484_v5 = vld [vmem:[#allocation11 + $0x8] sm:$0xff]  }
 0x229   :  { %2153 = vmatpush1.bf16.msra.mxu0 %v3429_v6  ;;  %v3485_v6 = vld [vmem:[#allocation11 + $0x10] sm:$0xff]  }
 0x22a   :  { %2154 = vmatprep.subr.bf16.mxu0 %v3434_v7  ;;  %v3486_v7 = vld [vmem:[#allocation11 + $0x18] sm:$0xff]  }
 0x22d   :  { %2155 = vmatpush1.bf16.msra.mxu0 %v3432_v8  ;;  %v3487_v8 = vld [vmem:[#allocation11 + $0x20] sm:$0xff]  }
 0x22e   :  { %2156 = vmatprep.subr.bf16.mxu0 %v3437_v9  ;;  %v3488_v9 = vld [vmem:[#allocation11 + $0x28] sm:$0xff]  }
 0x231   :  { %2157 = vmatpush1.bf16.msra.mxu0 %v3435_v10  ;;  %v3489_v10 = vld [vmem:[#allocation11 + $0x30] sm:$0xff]  }
 0x232   :  { %2158 = vmatprep.subr.bf16.mxu0 %v3440_v12  ;;  %v3490_v12 = vld [vmem:[#allocation11 + $0x38] sm:$0xff]  }
 0x235   :  { %2159 = vmatpush1.bf16.msra.mxu0 %v3438_v13  ;;  %v2904_v13 = vld [vmem:[%s3913_s8] ss:$0 sm:$0xff]  ;;  %s3623_s8 = scalar_lea.vmem %s2611_s24, 128 }
 0x236   :  { %2160 = vmatprep.subr.bf16.mxu0 %v3443_v14  ;;  %p3624_p6 = scmp.ne.s32.totalorder %s2611_s24, %s3623_s8  ;;  %p3629_p8 = scmp.lt.s32.totalorder %s3623_s8, %s3623_s8 }
 0x238   :  { %p3630_p9 = por %p3629_p8, %p3628_p7 }
 0x239   :  { %2161 = vmatpush1.bf16.msra.mxu0 %v3441_v15 }
 0x23a   :  { %2162 = vmatprep.subr.bf16.mxu0 %v3446_v16  ;;  %p3631_p10 = pnand %p3630_p9, %p3624_p6 }
 0x23d   :  { %2163 = vmatpush1.bf16.msra.mxu0 %v3444_v19 }
 0x23e   :  { %2164 = vmatprep.subr.bf16.mxu0 %v3449_v21 }
 0x241   :  { %2165 = vmatpush1.bf16.msra.mxu0 %v3447_v22 }
 0x242   :  { %2166 = vmatprep.subr.bf16.mxu0 %v3452_v23 }
 0x245   :  { %2167 = vmatpush1.bf16.msra.mxu0 %v3450_v24 }
 0x246   :  { %2168 = vmatprep.subr.bf16.mxu0 %v3455_v25 }
 0x249   :  { %2169 = vmatpush1.bf16.msra.mxu0 %v3453_v26  ;;  %v2913_v26 = vld [vmem:[%s3915_s10] ss:$0 sm:$0xff] }
 0x24a   :  { %2170 = vmatprep.subr.bf16.mxu0 %v3458_v27 }
 0x24d   :  { %2171 = vmatpush1.bf16.msra.mxu0 %v3456_v28 }
 0x250   :  { %2173 = vmatmul.mubr.bf16.vlgmr.msra.gmra.mrb[4].mxu0 %v1699_v63 }
 0x323   :  { %v2174_v38 = vpop.f32.mrb[4].mxu0 }
 0x324   :  { %v3023_v39 = vadd.f32 %v2174_v38, %v1770_v36  ;;  %v2176_v40 = vpop.f32.mrb[5].mxu0 }
 0x325   :  { %v3024_v41 = vadd.f32 %v2176_v40, %v1774_v37  ;;  %v2178_v42 = vpop.f32.mrb[6].mxu0 }
 0x326   :  { %v3025_v43 = vadd.f32 %v2178_v42, %v1770_v36  ;;  %v2180_v44 = vpop.f32.mrb[7].mxu0  ;;  %v2183_v0 = vmax.f32 %v3023_v39, 0.0 }
 0x327   :  { %v3026_v45 = vadd.f32 %v2180_v44, %v1774_v37  ;;  %v2184_v47 = vmax.f32 %v3024_v41, 0.0 }
 0x328   :  { %v2185_v46 = vmax.f32 %v3025_v43, 0.0 }
 0x329   :  { %v2186_v48 = vmax.f32 %v3026_v45, 0.0 }
 0x32a   :  { %v2187_v49 = vpack.c.bf16 %v2185_v46, %v2183_v0 }
 0x32b   :  { %v2188_v50 = vpack.c.bf16 %v2186_v48, %v2184_v47 }
 0x32d   :  { %2356 = vmatprep.mubr.bf16.mxu1 %v2188_v50 }
 0x32e   :  { %2357 = vmatmul.mubr.bf16.vlgmr.msra.gmra.mrb[8].mxu1 %v2187_v49 }
 0x32f   :  { %2972 = vmatpush3.bf16.msra.mxu1 %v3475_v51  ;;  %2987 = vmatprep.mubr.msk.bf16.mxu1 %vm3671_vm1, %v3670_v34 }
 0x330   :  { %2973 = vmatprep.subr.bf16.mxu1 %v3670_v34 }
 0x333   :  { %2974 = vmatpush3.bf16.msra.mxu1 %v3476_v17 }
 0x334   :  { %2975 = vmatprep.subr.bf16.mxu1 %v3670_v34 }
 0x337   :  { %2976 = vmatpush3.bf16.msra.mxu1 %v3477_v18 }
 0x338   :  { %2977 = vmatprep.subr.bf16.mxu1 %v3670_v34 }
 0x33b   :  { %2978 = vmatpush3.bf16.msra.mxu1 %v3478_v20 }
 0x33c   :  { %2979 = vmatprep.subr.bf16.mxu1 %v3670_v34 }
 0x33f   :  { %2980 = vmatpush3.bf16.msra.mxu1 %v3479_v11 }
 0x340   :  { %2981 = vmatprep.subr.bf16.mxu1 %v3670_v34 }
 0x343   :  { %2982 = vmatpush3.bf16.msra.mxu1 %v3480_v52 }
 0x344   :  { %2983 = vmatprep.subr.bf16.mxu1 %v3670_v34 }
 0x347   :  { %2984 = vmatpush3.bf16.msra.mxu1 %v3481_v53 }
 0x348   :  { %2985 = vmatprep.subr.bf16.mxu1 %v3670_v34 }
 0x34b   :  { %2986 = vmatpush3.bf16.msra.mxu1 %v3482_v54 }
 0x34c   :  { %2991 = vmatprep.subr.bf16.mxu1 %v3670_v34 }
 0x401   :  { %v2947_v55 = vpop.f32.mrb[8].mxu1 }
 0x402   :  { %v2948_v57 = vpop.f32.mrb[9].mxu1 }
 0x403   :  { %v2949_v58 = vadd.f32 %v2948_v57, %v2947_v55  ;;  %v2950_v59 = vpop.f32.mrb[10].mxu1 }
 0x404   :  { %v2951_v60 = vpop.f32.mrb[11].mxu1 }
 0x405   :  { %v2359_v61 = vadd.f32 %v2949_v58, %v2887_v56  ;;  %v2952_v62 = vadd.f32 %v2951_v60, %v2950_v59 }
 0x407   :  { %v2362_v63 = vadd.f32 %v2952_v62, %v2887_v56  ;;  %v2365_v1 = vmax.f32 %v2359_v61, 0.0 }
 0x409   :  { %v2366_v2 = vmax.f32 %v2362_v63, 0.0 }
 0x40b   :  { %v2367_v4 = vpack.c.bf16 %v2366_v2, %v2365_v1 }
 0x40d   :  { %2988 = vmatmul.mubr.bf16.vlgmr.msra.gmra.mrb[12].mxu1 %v2367_v4 }
 0x40e   :  { %2992 = vmatpush3.bf16.msra.mxu1 %v3483_v3  ;;  %3007 = vmatprep.mubr.msk.bf16.mxu1 %vm3671_vm1, %v3670_v34 }
 0x40f   :  { %2993 = vmatprep.subr.bf16.mxu1 %v3670_v34 }
 0x412   :  { %2994 = vmatpush3.bf16.msra.mxu1 %v3484_v5 }
 0x413   :  { %2995 = vmatprep.subr.bf16.mxu1 %v3670_v34 }
 0x416   :  { %2996 = vmatpush3.bf16.msra.mxu1 %v3485_v6 }
 0x417   :  { %2997 = vmatprep.subr.bf16.mxu1 %v3670_v34 }
 0x41a   :  { %2998 = vmatpush3.bf16.msra.mxu1 %v3486_v7 }
 0x41b   :  { %2999 = vmatprep.subr.bf16.mxu1 %v3670_v34 }
 0x41e   :  { %3000 = vmatpush3.bf16.msra.mxu1 %v3487_v8 }
 0x41f   :  { %3001 = vmatprep.subr.bf16.mxu1 %v3670_v34 }
 0x422   :  { %3002 = vmatpush3.bf16.msra.mxu1 %v3488_v9 }
 0x423   :  { %3003 = vmatprep.subr.bf16.mxu1 %v3670_v34 }
 0x426   :  { %3004 = vmatpush3.bf16.msra.mxu1 %v3489_v10 }
 0x427   :  { %3005 = vmatprep.subr.bf16.mxu1 %v3670_v34 }
 0x42a   :  { %3006 = vmatpush3.bf16.msra.mxu1 %v3490_v12 }
 0x4e0   :  { %v2473_v14 = vpop.f32.mrb[12].mxu1 }
 0x4e1   :  { %v2474_v15 = vadd.f32 %v2904_v13, %v2473_v14  ;;  %v2989_v16 = vpop.f32.mrb[13].mxu1 }
 0x4e2   :  { %v2476_v19 = vpop.f32.mrb[14].mxu1 }
 0x4e3   :  { %v2477_v21 = vadd.f32 %v2904_v13, %v2476_v19  ;;  %v2990_v22 = vpop.f32.mrb[15].mxu1  ;;  %v2480_v23 = vmax.f32 %v2474_v15, 0.0 }
 0x4e5   :  { %v2481_v24 = vmax.f32 %v2477_v21, 0.0 }
 0x4e7   :  { %v2482_v25 = vpack.c.bf16 %v2481_v24, %v2480_v23 }
 0x4e9   :  { %3008 = vmatmul.mubr.bf16.vlgmr.msra.gmra.mrb[16].mxu1 %v2482_v25 }
 0x5bc   :  { %v2588_v27 = vpop.f32.mrb[16].mxu1 }
 0x5bd   :  { %v3009_v28 = vpop.f32.mrb[17].mxu1  ;;  %v2589_v30 = vadd.f32 %v2913_v26, %v2588_v27 }
 0x5be   :  { %v2591_v29 = vpop.f32.mrb[18].mxu1 }
 0x5bf   :  { %v2592_v31 = vadd.f32 %v2913_v26, %v2591_v29  ;;  %v3010_v32 = vpop.f32.mrb[19].mxu1 }
 0x5c1   :  { %v2929_v33 = vpack.c.bf16 %v2592_v31, %v2589_v30 }
 0x5c3   :  { %2930 = vst [vmem:[#allocation13] sm:$0xff] %v2929_v33  }
 0x5c4   :  { %3634 = shalt.err (!%p3631_p10)
}
 0x5c5   :  { %s3635_s3 = scalar_lea.hbm %s3916_s11, 128 }
 0x5c6   :  { %p3636_p11 = scmp.ne.s32.totalorder %s3916_s11, %s3635_s3  ;;  %p3639_p12 = scmp.lt.u32.totalorder %s3635_s3, %s3916_s11 }
 0x5c8   :  { %p3641_p13 = pnand %p3639_p12, %p3636_p11 }
 0x5ca   :  { %3644 = shalt.err (!%p3641_p13)
}
 0x5cb   :  { %2616 = dma.vmem_to_hbm [thread:$0]  %s2611_s24, 128, %s3916_s11, [#allocation4], %s3659_s1, %s3659_s1, %s3660_s18  }
 0x5cc   :  { %3653 = dma.done.wait [#allocation4], 128  }
 0x5cd   :  { %3654 = vsyncadd [#allocation4], 4294967168 }
 0x5ce   :  { %2620 = vsyncpa [#allocation3], 1 }
 0x5cf   :  { %2621 = vsyncpa [#allocation6], 1 }
 0x5d0   :  { %2622 = vsyncpa [#allocation9], 1 }
 0x5d1   :  { %2623 = vsyncpa [#allocation12], 1 }
 0x5d2   :  { %2624 = vsyncpa [#allocation4], 1 }

</bundles_post_ra>
